<compile_context>
chip_gen: v7x
topology: tpu7x:2x2x1
jax: 0.10.0
libtpu: 0.0.40
codegen_flags: <defaults>
</compile_context>

<pallas_src>
import functools

import jax
import jax.numpy as jnp
from jax import lax
from jax.experimental import pallas as pl
from jax.experimental.pallas import tpu as pltpu

EPS = 1e-5
LANES = 128      # pad channel dims to multiples of the 128-wide lane dim
_WPAD = 8        # left/right pad (in W) of the conv2 staging buffer: keeps the
                 # f32 interior *store* and the halo-band zero stores sublane
                 # aligned; the 3 tap windows read at column offsets 7/8/9
                 # (cheap unaligned loads only)


def _round_up(x, m):
    return (x + m - 1) // m * m


# ----------------------------- Pallas kernel -------------------------------

def _bottleneck_kernel(x_ref, w1_ref, b1_ref, w2_ref, b2_ref, w3_ref, b3_ref,
                       o_ref, t1_ref, *, H, W):
    """Fused Bottleneck forward for one image (one grid step).

    x_ref  : (1, H, W, Cin_p)           bf16 input (channel-padded)
    w1_ref : (Cin_p, P_p)               bf16 conv1 weight, bn1 scale folded in
    w2_ref : (9, P_p, P_p)              bf16 conv2 taps (kh*3+kw), bn2 folded
    w3_ref : (P_p, Cout_p)              bf16 conv3 weight, bn3 scale folded in
    b*_ref : (1, C)                     f32 folded BN biases
    o_ref  : (1, H*W, Cout_p)           f32 output rows (lane dense)
    t1_ref : (H+2, W+2*_WPAD, P_p) f32  VMEM staging buffer with zero halo
    """
    cin_p = x_ref.shape[-1]
    pp = w2_ref.shape[-1]
    wbuf = t1_ref.shape[1]
    cdt = w1_ref.dtype                              # MXU compute dtype (bf16)

    # ---- conv1 (1x1) + bn1 + relu -----------------------------------------
    x2d = x_ref[0].reshape(H * W, cin_p)            # also reused as residual
    t1 = jnp.dot(x2d, w1_ref[...], preferred_element_type=jnp.float32)
    t1 = jnp.maximum(t1 + b1_ref[...], 0.0)         # (H*W, P_p) f32

    # ---- stage conv1 output with a zero halo ring (padding=1 for the 3x3) --
    # Zero only the halo that the tap windows actually read: top/bottom rows
    # plus two 8-wide (sublane-aligned) column bands.  The interior is written
    # exactly once below, so no full-buffer clear is needed.
    zero_row = jnp.zeros((1, wbuf, pp), jnp.float32)
    zero_band = jnp.zeros((H, _WPAD, pp), jnp.float32)
    t1_ref[0:1, :, :] = zero_row
    t1_ref[H + 1:H + 2, :, :] = zero_row
    t1_ref[1:H + 1, 0:_WPAD, :] = zero_band
    t1_ref[1:H + 1, _WPAD + W:_WPAD + W + _WPAD, :] = zero_band
    t1_ref[1:H + 1, _WPAD:_WPAD + W, :] = t1.reshape(H, W, pp)

    # ---- conv2 (3x3, stride 1, padding 1) + bn2 + relu ----------------------
    # nine shifted windows, each a dense MXU matmul, accumulated in f32.
    acc = None
    for kh in range(3):
        for kw in range(3):
            win = t1_ref[kh:kh + H, _WPAD - 1 + kw:_WPAD - 1 + kw + W, :]
            win = win.reshape(H * W, pp).astype(cdt)
            part = jnp.dot(win, w2_ref[kh * 3 + kw],
                           preferred_element_type=jnp.float32)
            acc = part if acc is None else acc + part
    t2 = jnp.maximum(acc + b2_ref[...], 0.0).astype(cdt)     # (H*W, P_p)

    # ---- conv3 (1x1) + bn3 + identity residual + relu -----------------------
    out = jnp.dot(t2, w3_ref[...], preferred_element_type=jnp.float32)
    out = out + b3_ref[...] + x2d.astype(jnp.float32)        # identity residual
    o_ref[0] = jnp.maximum(out, 0.0).astype(o_ref.dtype)


# ------------------------------ wrapper -------------------------------------

def _fold_bn(gamma, beta, mean, var):
    scale = gamma / jnp.sqrt(var + EPS)
    bias = beta - mean * scale
    return scale, bias


def bottleneck_forward(x_nchw, params, compute_dtype=jnp.bfloat16):
    """Bottleneck forward (stride=1, downsample=None). Input/output NCHW f32."""
    N, cin, H, W = x_nchw.shape
    planes = params["w1"].shape[-1]
    cout = params["w3"].shape[-1]
    assert cin == cout, "identity-residual path requires inplanes == planes*4"
    # TODO(synk): stride > 1 / non-None downsample branch not implemented.

    cin_p = _round_up(cin, LANES)
    pp = _round_up(planes, LANES)
    cout_p = _round_up(cout, LANES)          # == cin_p on the identity path

    # Fold BN scale into conv weights (f32), pad channels to lane multiples,
    # cast to the compute dtype.  Biases stay f32.
    s1, b1 = _fold_bn(*params["bn1"])
    s2, b2 = _fold_bn(*params["bn2"])
    s3, b3 = _fold_bn(*params["bn3"])
    w1 = params["w1"].reshape(cin, planes) * s1[None, :]
    w2 = params["w2"].reshape(9, planes, planes) * s2[None, None, :]
    w3 = params["w3"].reshape(planes, cout) * s3[None, :]

    w1p = jnp.zeros((cin_p, pp), jnp.float32).at[:cin, :planes].set(w1)
    w2p = jnp.zeros((9, pp, pp), jnp.float32).at[:, :planes, :planes].set(w2)
    w3p = jnp.zeros((pp, cout_p), jnp.float32).at[:planes, :cout].set(w3)
    b1p = jnp.zeros((1, pp), jnp.float32).at[0, :planes].set(b1)
    b2p = jnp.zeros((1, pp), jnp.float32).at[0, :planes].set(b2)
    b3p = jnp.zeros((1, cout_p), jnp.float32).at[0, :cout].set(b3)
    w1p, w2p, w3p = (w.astype(compute_dtype) for w in (w1p, w2p, w3p))

    # NCHW -> NHWC, pad channels to lane multiple, cast to bf16.
    x = jnp.transpose(x_nchw, (0, 2, 3, 1)).astype(compute_dtype)
    xp = jnp.zeros((N, H, W, cin_p), compute_dtype).at[..., :cin].set(x)

    itemsize = jnp.dtype(compute_dtype).itemsize
    flops = 2 * N * H * W * (cin_p * pp + 9 * pp * pp + pp * cout_p)
    bytes_accessed = (N * H * W * cin_p * itemsize
                      + (cin_p * pp + 9 * pp * pp + pp * cout_p) * itemsize
                      + (2 * pp + cout_p) * 4
                      + N * H * W * cout_p * 4)

    out = pl.pallas_call(
        functools.partial(_bottleneck_kernel, H=H, W=W),
        out_shape=jax.ShapeDtypeStruct((N, H * W, cout_p), jnp.float32),
        grid_spec=pltpu.PrefetchScalarGridSpec(
            num_scalar_prefetch=0,
            grid=(N,),
            in_specs=[
                pl.BlockSpec((1, H, W, cin_p), lambda n: (n, 0, 0, 0)),
                pl.BlockSpec((cin_p, pp), lambda n: (0, 0)),
                pl.BlockSpec((1, pp), lambda n: (0, 0)),
                pl.BlockSpec((9, pp, pp), lambda n: (0, 0, 0)),
                pl.BlockSpec((1, pp), lambda n: (0, 0)),
                pl.BlockSpec((pp, cout_p), lambda n: (0, 0)),
                pl.BlockSpec((1, cout_p), lambda n: (0, 0)),
            ],
            out_specs=pl.BlockSpec((1, H * W, cout_p), lambda n: (n, 0, 0)),
            scratch_shapes=[
                pltpu.VMEM((H + 2, W + 2 * _WPAD, pp), jnp.float32),
            ],
        ),
        compiler_params=pltpu.CompilerParams(
            dimension_semantics=("parallel",),     # batch shards across TCs
        ),
        cost_estimate=pl.CostEstimate(
            flops=flops, transcendentals=0, bytes_accessed=bytes_accessed),
    )(xp, w1p, b1p, w2p, b2p, w3p, b3p)

    out = out.reshape(N, H, W, cout_p)[..., :cout]
    return jnp.transpose(out, (0, 3, 1, 2)).astype(x_nchw.dtype)


# -------------------------- pure-JAX references ------------------------------

def _bn_apply(y, p):
    g, b, m, v = p
    return (y - m) / jnp.sqrt(v + EPS) * g + b


def bottleneck_reference(x_nchw, params):
    """Original-module (f32) semantics: conv -> BN -> relu x3, identity residual."""
    x = jnp.transpose(x_nchw, (0, 2, 3, 1))
    dn = ("NHWC", "HWIO", "NHWC")
    out = lax.conv_general_dilated(x, params["w1"], (1, 1), "VALID",
                                   dimension_numbers=dn)
    out = jax.nn.relu(_bn_apply(out, params["bn1"]))
    out = lax.conv_general_dilated(out, params["w2"], (1, 1), ((1, 1), (1, 1)),
                                   dimension_numbers=dn)
    out = jax.nn.relu(_bn_apply(out, params["bn2"]))
    out = lax.conv_general_dilated(out, params["w3"], (1, 1), "VALID",
                                   dimension_numbers=dn)
    out = jax.nn.relu(_bn_apply(out, params["bn3"]) + x)
    return jnp.transpose(out, (0, 3, 1, 2))


def _im2col_3x3(x_nhwc):
    N, H, W, C = x_nhwc.shape
    xpad = jnp.pad(x_nhwc, ((0, 0), (1, 1), (1, 1), (0, 0)))
    patches = [xpad[:, kh:kh + H, kw:kw + W, :]
               for kh in range(3) for kw in range(3)]
    return jnp.concatenate(patches, axis=-1)


def bottleneck_reference_lowp(x_nchw, params, dtype):
    """Mirrors the kernel's numerics: BN folded into weights (f32), weights and
    activations rounded to `dtype`, all matmuls accumulated in f32."""
    N, cin, H, W = x_nchw.shape
    planes = params["w1"].shape[-1]
    cout = params["w3"].shape[-1]
    M = N * H * W
    s1, b1 = _fold_bn(*params["bn1"])
    s2, b2 = _fold_bn(*params["bn2"])
    s3, b3 = _fold_bn(*params["bn3"])
    w1 = (params["w1"].reshape(cin, planes) * s1[None, :]).astype(dtype)
    w2 = (params["w2"].reshape(9 * planes, planes) * s2[None, :]).astype(dtype)
    w3 = (params["w3"].reshape(planes, cout) * s3[None, :]).astype(dtype)
    x = jnp.transpose(x_nchw, (0, 2, 3, 1)).astype(dtype)

    t = jnp.dot(x.reshape(M, cin), w1, preferred_element_type=jnp.float32)
    t = jax.nn.relu(t + b1).astype(dtype)
    p = _im2col_3x3(t.reshape(N, H, W, planes)).reshape(M, 9 * planes)
    t = jnp.dot(p, w2, preferred_element_type=jnp.float32)
    t = jax.nn.relu(t + b2).astype(dtype)
    out = jnp.dot(t, w3, preferred_element_type=jnp.float32)
    out = jax.nn.relu(out + b3 + x.reshape(M, cin).astype(jnp.float32))
    return jnp.transpose(out.reshape(N, H, W, cout), (0, 3, 1, 2))


# ------------------------------ param init ----------------------------------

def init_params(key, inplanes, planes):
    expansion = 4
    ks = jax.random.split(key, 6)

    def bn_params(k, c):
        k1, k2, k3, k4 = jax.random.split(k, 4)
        gamma = 1.0 + 0.1 * jax.random.normal(k1, (c,), jnp.float32)
        beta = 0.1 * jax.random.normal(k2, (c,), jnp.float32)
        mean = 0.1 * jax.random.normal(k3, (c,), jnp.float32)
        var = 0.5 + jnp.abs(jax.random.normal(k4, (c,), jnp.float32))
        return (gamma, beta, mean, var)

    return {
        # weights stored HWIO (NHWC conv convention)
        "w1": 0.1 * jax.random.normal(ks[0], (1, 1, inplanes, planes), jnp.float32),
        "w2": 0.1 * jax.random.normal(ks[1], (3, 3, planes, planes), jnp.float32),
        "w3": 0.1 * jax.random.normal(ks[2], (1, 1, planes, planes * expansion), jnp.float32),
        "bn1": bn_params(ks[3], planes),
        "bn2": bn_params(ks[4], planes),
        "bn3": bn_params(ks[5], planes * expansion),
    }


# --------------------------------- main --------------------------------------

if __name__ == "__main__":
    key = jax.random.PRNGKey(0)
    k_x, k_p = jax.random.split(key)

    # Bottleneck(inplanes=16, planes=4): identity-residual path, stride 1.
    N, planes = 2, 4
    inplanes = planes * 4
    H = W = 16
    x = jax.random.normal(k_x, (N, inplanes, H, W), jnp.float32)   # NCHW
    params = init_params(k_p, inplanes, planes)

    out = jax.block_until_ready(bottleneck_forward(x, params))
    assert out.shape == (N, planes * 4, H, W)

    ref_lowp = jax.block_until_ready(
        bottleneck_reference_lowp(x, params, jnp.bfloat16))
    ref_f32 = jax.block_until_ready(bottleneck_reference(x, params))

    err_lowp = float(jnp.max(jnp.abs(out - ref_lowp)))
    err_f32 = float(jnp.max(jnp.abs(out - ref_f32)))
    assert err_lowp < 1e-3, f"bf16-matched reference mismatch: {err_lowp}"
    assert err_f32 < 5e-2, f"module (f32) reference mismatch: {err_f32}"

    print("KERNEL_OK")
</pallas_src>

<mosaic_0001>
module attributes {stable_mosaic.version = 11 : i64} {
  func.func @_bottleneck_kernel(%arg0: i32, %arg1: memref<1x16x16x128xbf16, #tpu.memory_space<vmem>>, %arg2: memref<128x128xbf16, #tpu.memory_space<vmem>>, %arg3: memref<1x128xf32, #tpu.memory_space<vmem>>, %arg4: memref<9x128x128xbf16, #tpu.memory_space<vmem>>, %arg5: memref<1x128xf32, #tpu.memory_space<vmem>>, %arg6: memref<128x128xbf16, #tpu.memory_space<vmem>>, %arg7: memref<1x128xf32, #tpu.memory_space<vmem>>, %arg8: memref<1x256x128xf32, #tpu.memory_space<vmem>>, %arg9: memref<18x32x128xf32, #tpu.memory_space<vmem>>) attributes {dimension_semantics = [#tpu.dimension_semantics<parallel>], iteration_bounds = array<i64: 2>, scalar_prefetch = 0 : i64, scratch_operands = 1 : i64, tpu.core_type = #tpu.core_type<tc>, window_params = [{transform_indices = @transform_0, window_bounds = array<i64: 1, 16, 16, 128>}, {pipeline_mode = #tpu.pipeline_mode<synchronous>, transform_indices = @transform_1, window_bounds = array<i64: 128, 128>}, {pipeline_mode = #tpu.pipeline_mode<synchronous>, transform_indices = @transform_2, window_bounds = array<i64: 1, 128>}, {pipeline_mode = #tpu.pipeline_mode<synchronous>, transform_indices = @transform_3, window_bounds = array<i64: 9, 128, 128>}, {pipeline_mode = #tpu.pipeline_mode<synchronous>, transform_indices = @transform_4, window_bounds = array<i64: 1, 128>}, {pipeline_mode = #tpu.pipeline_mode<synchronous>, transform_indices = @transform_5, window_bounds = array<i64: 128, 128>}, {pipeline_mode = #tpu.pipeline_mode<synchronous>, transform_indices = @transform_6, window_bounds = array<i64: 1, 128>}, {transform_indices = @transform_7, window_bounds = array<i64: 1, 256, 128>}]} {
    %c0 = arith.constant 0 : index
    %c0_0 = arith.constant 0 : index
    %c0_1 = arith.constant 0 : index
    %c0_2 = arith.constant 0 : index
    %0 = vector.load %arg1[%c0, %c0_0, %c0_1, %c0_2] : memref<1x16x16x128xbf16, #tpu.memory_space<vmem>>, vector<1x16x16x128xbf16>
    %1 = vector.shape_cast %0 : vector<1x16x16x128xbf16> to vector<16x16x128xbf16>
    %2 = vector.shape_cast %1 : vector<16x16x128xbf16> to vector<256x128xbf16>
    %c0_3 = arith.constant 0 : index
    %c0_4 = arith.constant 0 : index
    %3 = vector.load %arg2[%c0_3, %c0_4] : memref<128x128xbf16, #tpu.memory_space<vmem>>, vector<128x128xbf16>
    %cst = arith.constant dense<0.000000e+00> : vector<256x128xf32>
    %4 = tpu.matmul %2, %3, %cst {dimension_numbers = #tpu.dot_dimension_numbers<[1], [0], [0], [1], [0, 0, 1, 1], [], []>} : vector<256x128xbf16>, vector<128x128xbf16>, vector<256x128xf32> -> vector<256x128xf32>
    %c0_5 = arith.constant 0 : index
    %c0_6 = arith.constant 0 : index
    %5 = vector.load %arg3[%c0_5, %c0_6] : memref<1x128xf32, #tpu.memory_space<vmem>>, vector<1x128xf32>
    %6 = vector.broadcast %5 : vector<1x128xf32> to vector<256x128xf32>
    %7 = arith.addf %4, %6 : vector<256x128xf32>
    %cst_7 = arith.constant 0.000000e+00 : f32
    %8 = vector.broadcast %cst_7 : f32 to vector<256x128xf32>
    %9 = arith.maximumf %7, %8 : vector<256x128xf32>
    %cst_8 = arith.constant 0.000000e+00 : f32
    %10 = vector.broadcast %cst_8 : f32 to vector<1x32x128xf32>
    %cst_9 = arith.constant 0.000000e+00 : f32
    %11 = vector.broadcast %cst_9 : f32 to vector<16x8x128xf32>
    %c0_10 = arith.constant 0 : index
    %c0_11 = arith.constant 0 : index
    %c0_12 = arith.constant 0 : index
    %12 = vector.load %arg9[%c0_10, %c0_11, %c0_12] : memref<18x32x128xf32, #tpu.memory_space<vmem>>, vector<1x32x128xf32>
    tpu.vector_store %arg9[%c0_10, %c0_11, %c0_12], %10 {strides = array<i32>} : memref<18x32x128xf32, #tpu.memory_space<vmem>>, vector<1x32x128xf32>,
    %c17 = arith.constant 17 : index
    %c0_13 = arith.constant 0 : index
    %c0_14 = arith.constant 0 : index
    %13 = vector.load %arg9[%c17, %c0_13, %c0_14] : memref<18x32x128xf32, #tpu.memory_space<vmem>>, vector<1x32x128xf32>
    tpu.vector_store %arg9[%c17, %c0_13, %c0_14], %10 {strides = array<i32>} : memref<18x32x128xf32, #tpu.memory_space<vmem>>, vector<1x32x128xf32>,
    %c1 = arith.constant 1 : index
    %c0_15 = arith.constant 0 : index
    %c0_16 = arith.constant 0 : index
    %14 = vector.load %arg9[%c1, %c0_15, %c0_16] : memref<18x32x128xf32, #tpu.memory_space<vmem>>, vector<16x8x128xf32>
    tpu.vector_store %arg9[%c1, %c0_15, %c0_16], %11 {strides = array<i32>} : memref<18x32x128xf32, #tpu.memory_space<vmem>>, vector<16x8x128xf32>,
    %c1_17 = arith.constant 1 : index
    %c24 = arith.constant 24 : index
    %c0_18 = arith.constant 0 : index
    %15 = vector.load %arg9[%c1_17, %c24, %c0_18] : memref<18x32x128xf32, #tpu.memory_space<vmem>>, vector<16x8x128xf32>
    tpu.vector_store %arg9[%c1_17, %c24, %c0_18], %11 {strides = array<i32>} : memref<18x32x128xf32, #tpu.memory_space<vmem>>, vector<16x8x128xf32>,
    %16 = vector.shape_cast %9 : vector<256x128xf32> to vector<16x16x128xf32>
    %c1_19 = arith.constant 1 : index
    %c8 = arith.constant 8 : index
    %c0_20 = arith.constant 0 : index
    %17 = vector.load %arg9[%c1_19, %c8, %c0_20] : memref<18x32x128xf32, #tpu.memory_space<vmem>>, vector<16x16x128xf32>
    tpu.vector_store %arg9[%c1_19, %c8, %c0_20], %16 {strides = array<i32>} : memref<18x32x128xf32, #tpu.memory_space<vmem>>, vector<16x16x128xf32>,
    %c0_21 = arith.constant 0 : index
    %c7 = arith.constant 7 : index
    %c0_22 = arith.constant 0 : index
    %18 = vector.load %arg9[%c0_21, %c7, %c0_22] : memref<18x32x128xf32, #tpu.memory_space<vmem>>, vector<16x16x128xf32>
    %19 = vector.shape_cast %18 : vector<16x16x128xf32> to vector<256x128xf32>
    %20 = arith.truncf %19 : vector<256x128xf32> to vector<256x128xbf16>
    %c0_23 = arith.constant 0 : index
    %c0_24 = arith.constant 0 : index
    %c0_25 = arith.constant 0 : index
    %21 = vector.load %arg4[%c0_23, %c0_24, %c0_25] : memref<9x128x128xbf16, #tpu.memory_space<vmem>>, vector<1x128x128xbf16>
    %22 = vector.shape_cast %21 : vector<1x128x128xbf16> to vector<128x128xbf16>
    %cst_26 = arith.constant dense<0.000000e+00> : vector<256x128xf32>
    %23 = tpu.matmul %20, %22, %cst_26 {dimension_numbers = #tpu.dot_dimension_numbers<[1], [0], [0], [1], [0, 0, 1, 1], [], []>} : vector<256x128xbf16>, vector<128x128xbf16>, vector<256x128xf32> -> vector<256x128xf32>
    %c0_27 = arith.constant 0 : index
    %c8_28 = arith.constant 8 : index
    %c0_29 = arith.constant 0 : index
    %24 = vector.load %arg9[%c0_27, %c8_28, %c0_29] : memref<18x32x128xf32, #tpu.memory_space<vmem>>, vector<16x16x128xf32>
    %25 = vector.shape_cast %24 : vector<16x16x128xf32> to vector<256x128xf32>
    %26 = arith.truncf %25 : vector<256x128xf32> to vector<256x128xbf16>
    %c1_30 = arith.constant 1 : index
    %c0_31 = arith.constant 0 : index
    %c0_32 = arith.constant 0 : index
    %27 = vector.load %arg4[%c1_30, %c0_31, %c0_32] : memref<9x128x128xbf16, #tpu.memory_space<vmem>>, vector<1x128x128xbf16>
    %28 = vector.shape_cast %27 : vector<1x128x128xbf16> to vector<128x128xbf16>
    %cst_33 = arith.constant dense<0.000000e+00> : vector<256x128xf32>
    %29 = tpu.matmul %26, %28, %cst_33 {dimension_numbers = #tpu.dot_dimension_numbers<[1], [0], [0], [1], [0, 0, 1, 1], [], []>} : vector<256x128xbf16>, vector<128x128xbf16>, vector<256x128xf32> -> vector<256x128xf32>
    %30 = arith.addf %23, %29 : vector<256x128xf32>
    %c0_34 = arith.constant 0 : index
    %c9 = arith.constant 9 : index
    %c0_35 = arith.constant 0 : index
    %31 = vector.load %arg9[%c0_34, %c9, %c0_35] : memref<18x32x128xf32, #tpu.memory_space<vmem>>, vector<16x16x128xf32>
    %32 = vector.shape_cast %31 : vector<16x16x128xf32> to vector<256x128xf32>
    %33 = arith.truncf %32 : vector<256x128xf32> to vector<256x128xbf16>
    %c2 = arith.constant 2 : index
    %c0_36 = arith.constant 0 : index
    %c0_37 = arith.constant 0 : index
    %34 = vector.load %arg4[%c2, %c0_36, %c0_37] : memref<9x128x128xbf16, #tpu.memory_space<vmem>>, vector<1x128x128xbf16>
    %35 = vector.shape_cast %34 : vector<1x128x128xbf16> to vector<128x128xbf16>
    %cst_38 = arith.constant dense<0.000000e+00> : vector<256x128xf32>
    %36 = tpu.matmul %33, %35, %cst_38 {dimension_numbers = #tpu.dot_dimension_numbers<[1], [0], [0], [1], [0, 0, 1, 1], [], []>} : vector<256x128xbf16>, vector<128x128xbf16>, vector<256x128xf32> -> vector<256x128xf32>
    %37 = arith.addf %30, %36 : vector<256x128xf32>
    %c1_39 = arith.constant 1 : index
    %c7_40 = arith.constant 7 : index
    %c0_41 = arith.constant 0 : index
    %38 = vector.load %arg9[%c1_39, %c7_40, %c0_41] : memref<18x32x128xf32, #tpu.memory_space<vmem>>, vector<16x16x128xf32>
    %39 = vector.shape_cast %38 : vector<16x16x128xf32> to vector<256x128xf32>
    %40 = arith.truncf %39 : vector<256x128xf32> to vector<256x128xbf16>
    %c3 = arith.constant 3 : index
    %c0_42 = arith.constant 0 : index
    %c0_43 = arith.constant 0 : index
    %41 = vector.load %arg4[%c3, %c0_42, %c0_43] : memref<9x128x128xbf16, #tpu.memory_space<vmem>>, vector<1x128x128xbf16>
    %42 = vector.shape_cast %41 : vector<1x128x128xbf16> to vector<128x128xbf16>
    %cst_44 = arith.constant dense<0.000000e+00> : vector<256x128xf32>
    %43 = tpu.matmul %40, %42, %cst_44 {dimension_numbers = #tpu.dot_dimension_numbers<[1], [0], [0], [1], [0, 0, 1, 1], [], []>} : vector<256x128xbf16>, vector<128x128xbf16>, vector<256x128xf32> -> vector<256x128xf32>
    %44 = arith.addf %37, %43 : vector<256x128xf32>
    %c1_45 = arith.constant 1 : index
    %c8_46 = arith.constant 8 : index
    %c0_47 = arith.constant 0 : index
    %45 = vector.load %arg9[%c1_45, %c8_46, %c0_47] : memref<18x32x128xf32, #tpu.memory_space<vmem>>, vector<16x16x128xf32>
    %46 = vector.shape_cast %45 : vector<16x16x128xf32> to vector<256x128xf32>
    %47 = arith.truncf %46 : vector<256x128xf32> to vector<256x128xbf16>
    %c4 = arith.constant 4 : index
    %c0_48 = arith.constant 0 : index
    %c0_49 = arith.constant 0 : index
    %48 = vector.load %arg4[%c4, %c0_48, %c0_49] : memref<9x128x128xbf16, #tpu.memory_space<vmem>>, vector<1x128x128xbf16>
    %49 = vector.shape_cast %48 : vector<1x128x128xbf16> to vector<128x128xbf16>
    %cst_50 = arith.constant dense<0.000000e+00> : vector<256x128xf32>
    %50 = tpu.matmul %47, %49, %cst_50 {dimension_numbers = #tpu.dot_dimension_numbers<[1], [0], [0], [1], [0, 0, 1, 1], [], []>} : vector<256x128xbf16>, vector<128x128xbf16>, vector<256x128xf32> -> vector<256x128xf32>
    %51 = arith.addf %44, %50 : vector<256x128xf32>
    %c1_51 = arith.constant 1 : index
    %c9_52 = arith.constant 9 : index
    %c0_53 = arith.constant 0 : index
    %52 = vector.load %arg9[%c1_51, %c9_52, %c0_53] : memref<18x32x128xf32, #tpu.memory_space<vmem>>, vector<16x16x128xf32>
    %53 = vector.shape_cast %52 : vector<16x16x128xf32> to vector<256x128xf32>
    %54 = arith.truncf %53 : vector<256x128xf32> to vector<256x128xbf16>
    %c5 = arith.constant 5 : index
    %c0_54 = arith.constant 0 : index
    %c0_55 = arith.constant 0 : index
    %55 = vector.load %arg4[%c5, %c0_54, %c0_55] : memref<9x128x128xbf16, #tpu.memory_space<vmem>>, vector<1x128x128xbf16>
    %56 = vector.shape_cast %55 : vector<1x128x128xbf16> to vector<128x128xbf16>
    %cst_56 = arith.constant dense<0.000000e+00> : vector<256x128xf32>
    %57 = tpu.matmul %54, %56, %cst_56 {dimension_numbers = #tpu.dot_dimension_numbers<[1], [0], [0], [1], [0, 0, 1, 1], [], []>} : vector<256x128xbf16>, vector<128x128xbf16>, vector<256x128xf32> -> vector<256x128xf32>
    %58 = arith.addf %51, %57 : vector<256x128xf32>
    %c2_57 = arith.constant 2 : index
    %c7_58 = arith.constant 7 : index
    %c0_59 = arith.constant 0 : index
    %59 = vector.load %arg9[%c2_57, %c7_58, %c0_59] : memref<18x32x128xf32, #tpu.memory_space<vmem>>, vector<16x16x128xf32>
    %60 = vector.shape_cast %59 : vector<16x16x128xf32> to vector<256x128xf32>
    %61 = arith.truncf %60 : vector<256x128xf32> to vector<256x128xbf16>
    %c6 = arith.constant 6 : index
    %c0_60 = arith.constant 0 : index
    %c0_61 = arith.constant 0 : index
    %62 = vector.load %arg4[%c6, %c0_60, %c0_61] : memref<9x128x128xbf16, #tpu.memory_space<vmem>>, vector<1x128x128xbf16>
    %63 = vector.shape_cast %62 : vector<1x128x128xbf16> to vector<128x128xbf16>
    %cst_62 = arith.constant dense<0.000000e+00> : vector<256x128xf32>
    %64 = tpu.matmul %61, %63, %cst_62 {dimension_numbers = #tpu.dot_dimension_numbers<[1], [0], [0], [1], [0, 0, 1, 1], [], []>} : vector<256x128xbf16>, vector<128x128xbf16>, vector<256x128xf32> -> vector<256x128xf32>
    %65 = arith.addf %58, %64 : vector<256x128xf32>
    %c2_63 = arith.constant 2 : index
    %c8_64 = arith.constant 8 : index
    %c0_65 = arith.constant 0 : index
    %66 = vector.load %arg9[%c2_63, %c8_64, %c0_65] : memref<18x32x128xf32, #tpu.memory_space<vmem>>, vector<16x16x128xf32>
    %67 = vector.shape_cast %66 : vector<16x16x128xf32> to vector<256x128xf32>
    %68 = arith.truncf %67 : vector<256x128xf32> to vector<256x128xbf16>
    %c7_66 = arith.constant 7 : index
    %c0_67 = arith.constant 0 : index
    %c0_68 = arith.constant 0 : index
    %69 = vector.load %arg4[%c7_66, %c0_67, %c0_68] : memref<9x128x128xbf16, #tpu.memory_space<vmem>>, vector<1x128x128xbf16>
    %70 = vector.shape_cast %69 : vector<1x128x128xbf16> to vector<128x128xbf16>
    %cst_69 = arith.constant dense<0.000000e+00> : vector<256x128xf32>
    %71 = tpu.matmul %68, %70, %cst_69 {dimension_numbers = #tpu.dot_dimension_numbers<[1], [0], [0], [1], [0, 0, 1, 1], [], []>} : vector<256x128xbf16>, vector<128x128xbf16>, vector<256x128xf32> -> vector<256x128xf32>
    %72 = arith.addf %65, %71 : vector<256x128xf32>
    %c2_70 = arith.constant 2 : index
    %c9_71 = arith.constant 9 : index
    %c0_72 = arith.constant 0 : index
    %73 = vector.load %arg9[%c2_70, %c9_71, %c0_72] : memref<18x32x128xf32, #tpu.memory_space<vmem>>, vector<16x16x128xf32>
    %74 = vector.shape_cast %73 : vector<16x16x128xf32> to vector<256x128xf32>
    %75 = arith.truncf %74 : vector<256x128xf32> to vector<256x128xbf16>
    %c8_73 = arith.constant 8 : index
    %c0_74 = arith.constant 0 : index
    %c0_75 = arith.constant 0 : index
    %76 = vector.load %arg4[%c8_73, %c0_74, %c0_75] : memref<9x128x128xbf16, #tpu.memory_space<vmem>>, vector<1x128x128xbf16>
    %77 = vector.shape_cast %76 : vector<1x128x128xbf16> to vector<128x128xbf16>
    %cst_76 = arith.constant dense<0.000000e+00> : vector<256x128xf32>
    %78 = tpu.matmul %75, %77, %cst_76 {dimension_numbers = #tpu.dot_dimension_numbers<[1], [0], [0], [1], [0, 0, 1, 1], [], []>} : vector<256x128xbf16>, vector<128x128xbf16>, vector<256x128xf32> -> vector<256x128xf32>
    %79 = arith.addf %72, %78 : vector<256x128xf32>
    %c0_77 = arith.constant 0 : index
    %c0_78 = arith.constant 0 : index
    %80 = vector.load %arg5[%c0_77, %c0_78] : memref<1x128xf32, #tpu.memory_space<vmem>>, vector<1x128xf32>
    %81 = vector.broadcast %80 : vector<1x128xf32> to vector<256x128xf32>
    %82 = arith.addf %79, %81 : vector<256x128xf32>
    %cst_79 = arith.constant 0.000000e+00 : f32
    %83 = vector.broadcast %cst_79 : f32 to vector<256x128xf32>
    %84 = arith.maximumf %82, %83 : vector<256x128xf32>
    %85 = arith.truncf %84 : vector<256x128xf32> to vector<256x128xbf16>
    %c0_80 = arith.constant 0 : index
    %c0_81 = arith.constant 0 : index
    %86 = vector.load %arg6[%c0_80, %c0_81] : memref<128x128xbf16, #tpu.memory_space<vmem>>, vector<128x128xbf16>
    %cst_82 = arith.constant dense<0.000000e+00> : vector<256x128xf32>
    %87 = tpu.matmul %85, %86, %cst_82 {dimension_numbers = #tpu.dot_dimension_numbers<[1], [0], [0], [1], [0, 0, 1, 1], [], []>} : vector<256x128xbf16>, vector<128x128xbf16>, vector<256x128xf32> -> vector<256x128xf32>
    %c0_83 = arith.constant 0 : index
    %c0_84 = arith.constant 0 : index
    %88 = vector.load %arg7[%c0_83, %c0_84] : memref<1x128xf32, #tpu.memory_space<vmem>>, vector<1x128xf32>
    %89 = vector.broadcast %88 : vector<1x128xf32> to vector<256x128xf32>
    %90 = arith.addf %87, %89 : vector<256x128xf32>
    %91 = arith.extf %2 : vector<256x128xbf16> to vector<256x128xf32>
    %92 = arith.addf %90, %91 : vector<256x128xf32>
    %cst_85 = arith.constant 0.000000e+00 : f32
    %93 = vector.broadcast %cst_85 : f32 to vector<256x128xf32>
    %94 = arith.maximumf %92, %93 : vector<256x128xf32>
    %c0_86 = arith.constant 0 : index
    %c0_87 = arith.constant 0 : index
    %c0_88 = arith.constant 0 : index
    %95 = vector.load %arg8[%c0_86, %c0_87, %c0_88] : memref<1x256x128xf32, #tpu.memory_space<vmem>>, vector<1x256x128xf32>
    %96 = vector.shape_cast %95 : vector<1x256x128xf32> to vector<256x128xf32>
    %97 = vector.shape_cast %94 : vector<256x128xf32> to vector<1x256x128xf32>
    tpu.vector_store %arg8[%c0_86, %c0_87, %c0_88], %97 {strides = array<i32>} : memref<1x256x128xf32, #tpu.memory_space<vmem>>, vector<1x256x128xf32>,
    return
  }
  func.func @transform_0(%arg0: i32) -> (i32, i32, i32, i32) {
    %c0_i32 = arith.constant 0 : i32
    %c0_i32_0 = arith.constant 0 : i32
    %c0_i32_1 = arith.constant 0 : i32
    %c0_i32_2 = arith.constant 0 : i32
    return %arg0, %c0_i32, %c0_i32_0, %c0_i32_1 : i32, i32, i32, i32
  }
  func.func @transform_1(%arg0: i32) -> (i32, i32) {
    %c0_i32 = arith.constant 0 : i32
    %c0_i32_0 = arith.constant 0 : i32
    %c0_i32_1 = arith.constant 0 : i32
    return %c0_i32, %c0_i32_0 : i32, i32
  }
  func.func @transform_2(%arg0: i32) -> (i32, i32) {
    %c0_i32 = arith.constant 0 : i32
    %c0_i32_0 = arith.constant 0 : i32
    %c0_i32_1 = arith.constant 0 : i32
    return %c0_i32, %c0_i32_0 : i32, i32
  }
  func.func @transform_3(%arg0: i32) -> (i32, i32, i32) {
    %c0_i32 = arith.constant 0 : i32
    %c0_i32_0 = arith.constant 0 : i32
    %c0_i32_1 = arith.constant 0 : i32
    %c0_i32_2 = arith.constant 0 : i32
    return %c0_i32, %c0_i32_0, %c0_i32_1 : i32, i32, i32
  }
  func.func @transform_4(%arg0: i32) -> (i32, i32) {
    %c0_i32 = arith.constant 0 : i32
    %c0_i32_0 = arith.constant 0 : i32
    %c0_i32_1 = arith.constant 0 : i32
    return %c0_i32, %c0_i32_0 : i32, i32
  }
  func.func @transform_5(%arg0: i32) -> (i32, i32) {
    %c0_i32 = arith.constant 0 : i32
    %c0_i32_0 = arith.constant 0 : i32
    %c0_i32_1 = arith.constant 0 : i32
    return %c0_i32, %c0_i32_0 : i32, i32
  }
  func.func @transform_6(%arg0: i32) -> (i32, i32) {
    %c0_i32 = arith.constant 0 : i32
    %c0_i32_0 = arith.constant 0 : i32
    %c0_i32_1 = arith.constant 0 : i32
    return %c0_i32, %c0_i32_0 : i32, i32
  }
  func.func @transform_7(%arg0: i32) -> (i32, i32, i32) {
    %c0_i32 = arith.constant 0 : i32
    %c0_i32_0 = arith.constant 0 : i32
    %c0_i32_1 = arith.constant 0 : i32
    return %arg0, %c0_i32, %c0_i32_0 : i32, i32, i32
  }
}

</mosaic_0001>

<bundles_post_ra>
// kernel: tpu_custom_call.1
= control target key start
LH: loop header
LB: loop body
LE: loop exit
PB: predicated region body
PF: predicated region fallthrough
CT: control target
= control target key end

     0   :  { %12 = vsyncpa [#allocation4], 0  ;;  %s6486_s0 = inlined_call_operand.hbm [shape: bf16[2,16,16,128], index: 0, kind: input, shape index: {}]   ;;  %s6487_s1 = inlined_call_operand.hbm [shape: bf16[128,128], index: 1, kind: input, shape index: {}]   ;;  %s6488_s2 = inlined_call_operand.vmem [shape: f32[1,128], index: 2, kind: input, shape index: {}]   ;;  %s6489_s3 = inlined_call_operand.hbm [shape: bf16[9,128,128], index: 3, kind: input, shape index: {}]   ;;  %s6490_s4 = inlined_call_operand.vmem [shape: f32[1,128], index: 4, kind: input, shape index: {}]   ;;  %s6491_s5 = inlined_call_operand.hbm [shape: bf16[128,128], index: 5, kind: input, shape index: {}]   ;;  %s6492_s6 = inlined_call_operand.vmem [shape: f32[1,128], index: 6, kind: input, shape index: {}]   ;;  %s6493_s7 = inlined_call_operand.hbm [shape: f32[2,256,128], index: 7, kind: output, shape index: {}]  }
   0x1   :  { %14 = vsyncpa [#allocation4 + $0x1], 0 }
   0x2   :  { %15 = vsyncpa [#allocation7], 0 }
   0x3   :  { %16 = vsyncpa [#allocation10], 0 }
   0x4   :  { %17 = vsyncpa [#allocation5], 0 }
   0x5   :  { %19 = vsyncpa [#allocation5 + $0x1], 0  ;;  %s5714_s24 = smov 0   ;;  %s5716_s25 = smov 0  }
   0x6   :  { %s5718_s26 = smov 0   ;;  %s5720_s27 = smov 0  }
   0x7 LB: > { %s5735_s28 = sadd.s32 4294967295, %s5661_s27   ;;  %s4061_s29 = sadd.s32 4294967294, %s5661_s27   ;;  %s5661_s27 = sphi %s5720_s27, %s6519_s27   ;;  %s5657_s26 = sphi %s5718_s26, %s6518_s26   ;;  %s5653_s25 = sphi %s5716_s25, %s6517_s25   ;;  %s5649_s24 = sphi %s5714_s24, %s6516_s24  }
   0x8   : > { %p45_p0 = scmp.ne.s32.totalorder %s5653_s25, %s5649_s24  ;;  %p6494_p1 = scmp.eq.s32.totalorder %s5735_s28, 0 }
   0x9   : > { %p201_p3 = scmp.eq.s32.totalorder %s4061_s29, 1  ;;  %p4062_p5 = scmp.ge.s32.totalorder %s5661_s27, 1 }
   0xa   : > { %p5744_p4 = por %p6494_p1, %p45_p0  ;;  %p208_p7 = scmp.lt.s32.totalorder %s5661_s27, 3 }
   0xb   : > { %p5749_p6 = por %p201_p3, %p45_p0  ;;  %s5663_s10 = smov [#allocation6]  }
   0xc   : > { %s6498_s30 = scalar_select %p5744_p4, 1, 0 }
   0xd   : > { %s6499_s8 = scalar_select %p5749_p6, 1, 0 }
   0xe   : > { %p5754_p8 = pnand %p4062_p5, %p208_p7  ;;  %s220_s11 = sshll.u32 %s5663_s10, 4  ;;  %s5758_s11 = int_to_ptr.vmem [resolvable:$true] %s220_s11 }
   0xf   : > { %6500 = sst [smem:[#allocation16_spill]] %s6499_s8  ;;  %s5664_s13 = smov [#allocation8]  }
  0x10   : > { %s6501_s9 = scalar_select %p5754_p8, 1, 0 }
  0x11   : > { %p5270_p9 = pneg %p5754_p8  ;;  %s236_s14 = sshll.u32 %s5664_s13, 4  ;;  %s5769_s14 = int_to_ptr.vmem [resolvable:$true] %s236_s14 }
  0x12   : > { %s5665_s15 = smov [#allocation9]   ;;  %s5473_s19 = scalar_lea.hbm %s6487_s1, 1024 }
  0x13   : > { %p5765_p11 = pnand %p5270_p9, %p6494_p1  ;;  %s5771_s16 = sshll.u32 %s5665_s15, 4  ;;  %s253_s16 = int_to_ptr.vmem [resolvable:$true] %s5771_s16 }
  0x14   : > { %p5474_p12 = scmp.ne.s32.totalorder %s6487_s1, %s5473_s19  ;;  %p5480_p5 = scmp.lt.u32.totalorder %s5473_s19, %s6487_s1 }
  0x15   : > { %p5781_p13 = pneg %p5765_p11 }
  0x17   : > { %p5476_p0 = pnand %p5781_p13, %p5474_p12 }
  0x19   : > { %p5477_p3 = pneg %p5476_p0 }
  0x1b   : > { %p5482_p7 = pnand %p5480_p5, %p5477_p3 }
  0x1d   : > { %5485 = shalt.err (!%p5482_p7)
}
  0x1e   : > { %s5486_s10 = scalar_lea.vmem %s5758_s11, 1024  ;;  %p5494_p2 = scmp.lt.s32.totalorder %s5758_s11, %s5758_s11 }
  0x1f   : > { %p5487_p9 = scmp.ne.s32.totalorder %s5758_s11, %s5486_s10  ;;  %p5495_p6 = scmp.lt.s32.totalorder %s5486_s10, %s5486_s10 }
  0x21   : > { %p5489_p10 = pnand %p5487_p9, %p5781_p13  ;;  %p5496_p12 = por %p5495_p6, %p5494_p2 }
  0x23   : > { %p5490_p1 = pneg %p5489_p10 }
  0x25   : > { %p5497_p0 = pnand %p5496_p12, %p5490_p1 }
  0x27   : > { %5500 = shalt.err (!%p5497_p0)
}
  0x28   : > { %s5666_s13 = smov 64   ;;  %s5667_s15 = smov 4  }
  0x29   : > { %5273 = dma.hbm_to_vmem [thread:$0]  (!%p5765_p11), %s6487_s1, 1024, %s5758_s11, [#allocation7], %s5666_s13, %s5666_s13, %s5667_s15  }
  0x2a   : > { %s5501_s21 = scalar_lea.hbm %s6489_s3, 9216 }
  0x2b   : > { %p5502_p1 = scmp.ne.s32.totalorder %s6489_s3, %s5501_s21  ;;  %p5508_p10 = scmp.lt.u32.totalorder %s5501_s21, %s6489_s3 }
  0x2d   : > { %p5504_p2 = pnand %p5502_p1, %p5781_p13 }
  0x2f   : > { %p5505_p6 = pneg %p5504_p2 }
  0x31   : > { %p5510_p3 = pnand %p5508_p10, %p5505_p6 }
  0x33   : > { %5513 = shalt.err (!%p5510_p3)
}
  0x34   : > { %s5514_s11 = scalar_lea.vmem %s5769_s14, 9216  ;;  %p5522_p12 = scmp.lt.s32.totalorder %s5769_s14, %s5769_s14 }
  0x35   : > { %p5515_p5 = scmp.ne.s32.totalorder %s5769_s14, %s5514_s11  ;;  %p5523_p0 = scmp.lt.s32.totalorder %s5514_s11, %s5514_s11 }
  0x37   : > { %p5517_p7 = pnand %p5515_p5, %p5781_p13  ;;  %p5524_p1 = por %p5523_p0, %p5522_p12 }
  0x39   : > { %p5518_p9 = pneg %p5517_p7 }
  0x3b   : > { %p5525_p2 = pnand %p5524_p1, %p5518_p9 }
  0x3d   : > { %5528 = shalt.err (!%p5525_p2)
}
  0x3e   : > { %5276 = dma.hbm_to_vmem [thread:$0]  (!%p5765_p11), %s6489_s3, 9216, %s5769_s14, [#allocation7], %s5666_s13, %s5666_s13, %s5667_s15  }
  0x3f   : > { %s5529_s20 = scalar_lea.hbm %s6491_s5, 1024 }
  0x40   : > { %p5530_p6 = scmp.ne.s32.totalorder %s6491_s5, %s5529_s20  ;;  %p5536_p5 = scmp.lt.u32.totalorder %s5529_s20, %s6491_s5 }
  0x42   : > { %p5532_p10 = pnand %p5530_p6, %p5781_p13 }
  0x44   : > { %p5533_p3 = pneg %p5532_p10 }
  0x46   : > { %p5538_p7 = pnand %p5536_p5, %p5533_p3 }
  0x48   : > { %5541 = shalt.err (!%p5538_p7)
}
  0x49   : > { %s5542_s11 = scalar_lea.vmem %s253_s16, 1024  ;;  %p5550_p1 = scmp.lt.s32.totalorder %s253_s16, %s253_s16 }
  0x4a   : > { %p5543_p9 = scmp.ne.s32.totalorder %s253_s16, %s5542_s11  ;;  %p5551_p2 = scmp.lt.s32.totalorder %s5542_s11, %s5542_s11 }
  0x4c   : > { %p5545_p12 = pnand %p5543_p9, %p5781_p13  ;;  %p5552_p4 = por %p5551_p2, %p5550_p1 }
  0x4e   : > { %p5546_p0 = pneg %p5545_p12 }
  0x50   : > { %p5553_p8 = pnand %p5552_p4, %p5546_p0 }
  0x52   : > { %5556 = shalt.err (!%p5553_p8)
}
  0x53   : > { %5279 = dma.hbm_to_vmem [thread:$0]  (!%p5765_p11), %s6491_s5, 1024, %s253_s16, [#allocation10], %s5666_s13, %s5666_s13, %s5667_s15  }
  0x54   : > { %s5854_s22 = sadd.s32 1, %s5661_s27   ;;  %s32_s17 = sadd.s32 1, %s5657_s26 }
  0x55   : > { %s29_s12 = ssub.s32 %s5661_s27, %s5854_s22  ;;  %p39_p8 = scmp.ne.s32.totalorder %s5657_s26, %s5653_s25 }
  0x56   : > { %p30_p4 = scmp.eq.s32.totalorder %s29_s12, 0  ;;  %p40_p13 = scmp.eq.s32.totalorder %s5661_s27, 0 }
  0x57   : > { %p5291_p6 = scmp.lt.s32.totalorder %s5661_s27, 2  ;;  %p6504_p3 = scmp.eq.s32.totalorder %s5735_s28, 1 }
  0x58   : > { %s5864_s18 = scalar_select %p30_p4, %s5657_s26, %s32_s17  }
  0x59   : > { %p41_p10 = por %p40_p13, %p39_p8  ;;  %p5868_p5 = por %p6504_p3, %p39_p8 }
  0x5a   : > { %s269_s20 = sand.u32 1, %s5657_s26   ;;  %s4188_s21 = sshll.u32 %s5661_s27, 11 }
  0x5b   : > { %s4067_s16 = sshll.u32 %s269_s20, 7  ;;  %s5877_s10 = scalar_lea.hbm %s6486_s0, %s4188_s21 }
  0x5c   : > { %s273_s11 = scalar_lea.vmem [#allocation3], %s4067_s16  ;;  %p5879_p11 = pnand %p5291_p6, %p41_p10 }
  0x5d   : > { %s280_s14 = sshll.u32 %s273_s11, 4  ;;  %s5885_s12 = scalar_lea.sflag [#allocation4], %s269_s20  ;;  %s5883_s14 = int_to_ptr.vmem [resolvable:$true] %s280_s14 }
  0x5e   : > { %s5557_s17 = scalar_lea.hbm %s5877_s10, 2048  ;;  %p5559_p9 = pneg %p5879_p11 }
  0x5f   : > { %p5558_p7 = scmp.ne.s32.totalorder %s5877_s10, %s5557_s17  ;;  %s5562_s23 = scalar_lea.hbm %s6486_s0, 4096 }
  0x60   : > { %p5563_p1 = scmp.lt.u32.totalorder %s5877_s10, %s6486_s0  ;;  %p5564_p2 = scmp.lt.u32.totalorder %s5562_s23, %s5557_s17 }
  0x61   : > { %p5560_p12 = pnand %p5559_p9, %p5558_p7  ;;  %p5566_p8 = scmp.lt.u32.totalorder %s5557_s17, %s5877_s10 }
  0x62   : > { %p5565_p4 = por %p5564_p2, %p5563_p1 }
  0x63   : > { %p5561_p0 = pneg %p5560_p12 }
  0x64   : > { %p5567_p13 = por %p5566_p8, %p5565_p4 }
  0x66   : > { %p5568_p6 = pnand %p5567_p13, %p5561_p0 }
  0x68   : > { %5571 = shalt.err (!%p5568_p6)
}
  0x69   : > { %s5572_s20 = scalar_lea.vmem %s5883_s14, 2048  ;;  %s5668_s21 = smov [#allocation3]  }
  0x6a   : > { %p5573_p10 = scmp.ne.s32.totalorder %s5883_s14, %s5572_s20  ;;  %s5577_s16 = sshll.u32 %s5668_s21, 4  ;;  %s5578_s16 = int_to_ptr.vmem [resolvable:$false] %s5577_s16 }
  0x6b   : > { %s5579_s29 = scalar_lea.vmem %s5578_s16, 4096  ;;  %p5580_p12 = scmp.lt.s32.totalorder %s5883_s14, %s5578_s16 }
  0x6c   : > { %p5575_p3 = pnand %p5573_p10, %p5559_p9  ;;  %p5581_p1 = scmp.lt.s32.totalorder %s5579_s29, %s5572_s20 }
  0x6e   : > { %p5576_p7 = pneg %p5575_p3  ;;  %p5582_p2 = por %p5581_p1, %p5580_p12 }
  0x70   : > { %p5583_p4 = pnand %p5582_p2, %p5576_p7 }
  0x72   : > { %5586 = shalt.err (!%p5583_p4)
}
  0x73   : > { %5283 = dma.hbm_to_vmem [thread:$0]  (!%p5879_p11), %s5877_s10, 2048, %s5883_s14, %s5885_s12, %s5666_s13, %s5666_s13, %s5667_s15  }
  0x74   : > { %p6507_p9 = scmp.ne.s32.totalorder %s6501_s9, 0 }
  0x75   : > { %s5919_s17 = sand.u32 (!%p6507_p9), 1, %s5653_s25   ;;  %p6508_p0 = scmp.ne.s32.totalorder (!%p6507_p9), %s6498_s30, 0 }
  0x76   : > { %292 = sbr.rel (%p6507_p9) target bundleno = 1232 (0x4d0), region = 48  ;;  %s4071_s23 = sshll.u32 (!%p6507_p9), %s5919_s17, 7 }
  0x77   : > { %s295_s11 = scalar_lea.sflag (!%p6507_p9), [#allocation4], %s5919_s17  ;;  %s5923_s20 = scalar_lea.vmem (!%p6507_p9), [#allocation3], %s4071_s23 }
  0x7d   : > { %5632 = dma.done.wait (%p6508_p0), %s295_s11, 2048  }
  0x7e   : > { %5634 = vsyncadd (%p6508_p0), %s295_s11, 4294965248  ;;  %p6509_p11 = scmp.eq.s32.totalorder %s5735_s28, 0 }
  0x80   : > { %5636 = dma.done.wait (%p6509_p11), [#allocation7], 10240   ;;  %p6510_p8 = pmov %p6509_p11 }
  0x82   : > { %5638 = vsyncadd (%p6510_p8), [#allocation7], 4294957056  ;;  %p6511_p13 = pmov %p6510_p8 }
  0x83   : > { %p6512_p6 = pmov %p6510_p8 }
  0x84   : > { %5640 = dma.done.wait (%p6511_p13), [#allocation10], 1024  }
  0x85   : > { %5642 = vsyncadd (%p6512_p6), [#allocation10], 4294966272  ;;  %v5336_v0 = vld [vmem:[#allocation6] sm:$0xff]   ;;  %v5337_v1 = vld [vmem:[#allocation6 + $0x8] sm:$0xff]   ;;  %v5669_v32 = vmov 0.0   ;;  %v5670_v33 = vmov 0.0|0.0  }
  0x86   : > { %4454 = vmatprep.subr.bf16.mxu0 %v5336_v0  ;;  %v5338_v2 = vld [vmem:[#allocation6 + $0x10] sm:$0xff]   ;;  %v5339_v3 = vld [vmem:[#allocation6 + $0x18] sm:$0xff]   ;;  %v342_v4 = vld [vmem:[%s5923_s20] sm:$0xff]   ;;  %735 = vst [vmem:[#allocation2 + $0x8] sm:$0xff] %v5669_v32  ;;  %s4075_s8 = sshll.u32 %s5919_s17, 8  ;;  %s4189_s21 = sshll.u32 %s5735_s28, 12 }
  0x87   : > { %4455 = vmatpush3.bf16.msra.mxu0 %v5336_v0  ;;  %4470 = vmatprep.mubr.bf16.mxu0 %v342_v4  ;;  %v5340_v5 = vld [vmem:[#allocation6 + $0x20] sm:$0xff]   ;;  %v5341_v6 = vld [vmem:[#allocation6 + $0x28] sm:$0xff]   ;;  %v5342_v7 = vld [vmem:[#allocation6 + $0x30] sm:$0xff]   ;;  %736 = vst [vmem:[#allocation2 + $0x10] sm:$0xff] %v5669_v32  ;;  %s6359_s12 = scalar_lea.vmem [#allocation11], %s4075_s8  ;;  %s6437_s11 = scalar_lea.hbm %s6493_s7, %s4189_s21 }
  0x88   : > { %4456 = vmatprep.subr.bf16.mxu0 %v5337_v1  ;;  %v5343_v8 = vld [vmem:[#allocation6 + $0x38] sm:$0xff]   ;;  %v344_v9 = vld [vmem:[%s5923_s20 + $0x8] sm:$0xff]   ;;  %v346_v10 = vld [vmem:[%s5923_s20 + $0x10] sm:$0xff]   ;;  %734 = vst [vmem:[#allocation2] sm:$0xff] %v5669_v32  ;;  %s3959_s16 = sshll.u32 %s6359_s12, 4  ;;  %s3946_s28 = scalar_lea.sflag [#allocation5], %s5919_s17  ;;  %s6439_s16 = int_to_ptr.vmem [resolvable:$true] %s3959_s16 }
  0x89   : > { %v5360_v11 = vld [vmem:[#allocation8 + $0x40] sm:$0xff]   ;;  %v5361_v12 = vld [vmem:[#allocation8 + $0x48] sm:$0xff]   ;;  %v348_v13 = vld [vmem:[%s5923_s20 + $0x18] sm:$0xff]   ;;  %737 = vst [vmem:[#allocation2 + $0x18] sm:$0xff] %v5669_v32  ;;  %s5671_s30 = smov [#allocation11]  }
  0x8a   : > { %v350_v14 = vld [vmem:[%s5923_s20 + $0x20] sm:$0xff]   ;;  %v5362_v15 = vld [vmem:[#allocation8 + $0x50] sm:$0xff]   ;;  %v5363_v16 = vld [vmem:[#allocation8 + $0x58] sm:$0xff]   ;;  %739 = vst [vmem:[#allocation2 + $0x220] sm:$0xff] %v5669_v32  ;;  %s5591_s9 = sshll.u32 %s5671_s30, 4  ;;  %s5592_s9 = int_to_ptr.vmem [resolvable:$false] %s5591_s9 }
  0x8b   : > { %4457 = vmatpush3.bf16.msra.mxu0 %v5337_v1  ;;  %v352_v17 = vld [vmem:[%s5923_s20 + $0x28] sm:$0xff]   ;;  %v354_v18 = vld [vmem:[%s5923_s20 + $0x30] sm:$0xff]   ;;  %v356_v19 = vld [vmem:[%s5923_s20 + $0x38] sm:$0xff]   ;;  %740 = vst [vmem:[#allocation2 + $0x228] sm:$0xff] %v5669_v32  ;;  %s5593_s13 = scalar_lea.vmem %s5592_s9, 8192  ;;  %p5594_p12 = scmp.lt.s32.totalorder %s6439_s16, %s5592_s9 }
  0x8c   : > { %4458 = vmatprep.subr.bf16.mxu0 %v5338_v2  ;;  %v358_v20 = vld [vmem:[%s5923_s20 + $0x40] sm:$0xff]   ;;  %v360_v21 = vld [vmem:[%s5923_s20 + $0x48] sm:$0xff]   ;;  %v362_v22 = vld [vmem:[%s5923_s20 + $0x50] sm:$0xff]   ;;  %741 = vst [vmem:[#allocation2 + $0x230] sm:$0xff] %v5669_v32 }
  0x8d   : > { %v364_v23 = vld [vmem:[%s5923_s20 + $0x58] sm:$0xff]   ;;  %v366_v24 = vld [vmem:[%s5923_s20 + $0x60] sm:$0xff]   ;;  %v368_v25 = vld [vmem:[%s5923_s20 + $0x68] sm:$0xff]   ;;  %742 = vst [vmem:[#allocation2 + $0x238] sm:$0xff] %v5669_v32 }
  0x8e   : > { %v370_v26 = vld [vmem:[%s5923_s20 + $0x70] sm:$0xff]   ;;  %v372_v27 = vld [vmem:[%s5923_s20 + $0x78] sm:$0xff]   ;;  %v5364_v28 = vld [vmem:[#allocation8 + $0x60] sm:$0xff]   ;;  %744 = vst [vmem:[#allocation2 + $0x20] sm:$0xff] %v5669_v32 }
  0x8f   : > { %4459 = vmatpush3.bf16.msra.mxu0 %v5338_v2  ;;  %v5365_v29 = vld [vmem:[#allocation8 + $0x68] sm:$0xff]   ;;  %v5366_v30 = vld [vmem:[#allocation8 + $0x70] sm:$0xff]   ;;  %v5367_v31 = vld [vmem:[#allocation8 + $0x78] sm:$0xff]   ;;  %745 = vst [vmem:[#allocation2 + $0x40] sm:$0xff] %v5669_v32 }
  0x90   : > { %4460 = vmatprep.subr.bf16.mxu0 %v5339_v3  ;;  %746 = vst [vmem:[#allocation2 + $0x60] sm:$0xff] %v5669_v32  ;;  %747 = vst [vmem:[#allocation2 + $0x80] sm:$0xff] %v5669_v32  ;;  %v5953_v34 = vld [vmem:[#allocation8 + $0xc0] sm:$0xff]   ;;  %v5957_v35 = vld [vmem:[#allocation8 + $0xc8] sm:$0xff]  }
  0x91   : > { %748 = vst [vmem:[#allocation2 + $0xa0] sm:$0xff] %v5669_v32  ;;  %749 = vst [vmem:[#allocation2 + $0xc0] sm:$0xff] %v5669_v32  ;;  %4982 = vmatprep.subr.bf16.mxu1 %v5953_v34  ;;  %v5961_v36 = vld [vmem:[#allocation8 + $0xd0] sm:$0xff]   ;;  %v5965_v37 = vld [vmem:[#allocation8 + $0xd8] sm:$0xff]  }
  0x92   : > { %750 = vst [vmem:[#allocation2 + $0xe0] sm:$0xff] %v5669_v32  ;;  %751 = vst [vmem:[#allocation2 + $0x100] sm:$0xff] %v5669_v32  ;;  %4990 = vmatpush3.bf16.msra.mxu1 %v5953_v34  ;;  %v5969_v38 = vld [vmem:[#allocation8 + $0xe0] sm:$0xff]   ;;  %v5973_v39 = vld [vmem:[#allocation8 + $0xe8] sm:$0xff]  }
  0x93   : > { %4461 = vmatpush3.bf16.msra.mxu0 %v5339_v3  ;;  %752 = vst [vmem:[#allocation2 + $0x120] sm:$0xff] %v5669_v32  ;;  %753 = vst [vmem:[#allocation2 + $0x140] sm:$0xff] %v5669_v32  ;;  %4983 = vmatprep.subr.bf16.mxu1 %v5957_v35  ;;  %v5376_v40 = vld [vmem:[#allocation8] sm:$0xff]   ;;  %v5977_v41 = vld [vmem:[#allocation8 + $0xf0] sm:$0xff]  }
  0x94   : > { %4462 = vmatprep.subr.bf16.mxu0 %v5340_v5  ;;  %754 = vst [vmem:[#allocation2 + $0x160] sm:$0xff] %v5669_v32  ;;  %755 = vst [vmem:[#allocation2 + $0x180] sm:$0xff] %v5669_v32  ;;  %v5981_v42 = vld [vmem:[#allocation8 + $0xf8] sm:$0xff]   ;;  %v5985_v43 = vld [vmem:[#allocation8 + $0x100] sm:$0xff]  }
  0x95   : > { %756 = vst [vmem:[#allocation2 + $0x1a0] sm:$0xff] %v5669_v32  ;;  %757 = vst [vmem:[#allocation2 + $0x1c0] sm:$0xff] %v5669_v32  ;;  %v5991_v44 = vld [vmem:[%s6488_s2] ss:$0 sm:$0xff]  ;;  %v5378_v60 = vld [vmem:[#allocation8 + $0x8] sm:$0xff]  }
  0x96   : > { %758 = vst [vmem:[#allocation2 + $0x1e0] sm:$0xff] %v5669_v32  ;;  %759 = vst [vmem:[#allocation2 + $0x200] sm:$0xff] %v5669_v32  ;;  %4991 = vmatpush3.bf16.msra.mxu1 %v5957_v35 }
  0x97   : > { %4463 = vmatpush3.bf16.msra.mxu0 %v5340_v5  ;;  %760 = vst [vmem:[#allocation2 + $0x38] sm:$0xff] %v5669_v32  ;;  %761 = vst [vmem:[#allocation2 + $0x58] sm:$0xff] %v5669_v32  ;;  %4984 = vmatprep.subr.bf16.mxu1 %v5961_v36 }
  0x98   : > { %4464 = vmatprep.subr.bf16.mxu0 %v5341_v6  ;;  %762 = vst [vmem:[#allocation2 + $0x78] sm:$0xff] %v5669_v32  ;;  %763 = vst [vmem:[#allocation2 + $0x98] sm:$0xff] %v5669_v32 }
  0x99   : > { %764 = vst [vmem:[#allocation2 + $0xb8] sm:$0xff] %v5669_v32  ;;  %765 = vst [vmem:[#allocation2 + $0xd8] sm:$0xff] %v5669_v32 }
  0x9a   : > { %766 = vst [vmem:[#allocation2 + $0xf8] sm:$0xff] %v5669_v32  ;;  %767 = vst [vmem:[#allocation2 + $0x118] sm:$0xff] %v5669_v32  ;;  %4992 = vmatpush3.bf16.msra.mxu1 %v5961_v36 }
  0x9b   : > { %4465 = vmatpush3.bf16.msra.mxu0 %v5341_v6  ;;  %768 = vst [vmem:[#allocation2 + $0x138] sm:$0xff] %v5669_v32  ;;  %769 = vst [vmem:[#allocation2 + $0x158] sm:$0xff] %v5669_v32  ;;  %4985 = vmatprep.subr.bf16.mxu1 %v5965_v37  ;;  %v5380_v6 = vld [vmem:[#allocation8 + $0x10] sm:$0xff]  }
  0x9c   : > { %4466 = vmatprep.subr.bf16.mxu0 %v5342_v7  ;;  %770 = vst [vmem:[#allocation2 + $0x178] sm:$0xff] %v5669_v32  ;;  %771 = vst [vmem:[#allocation2 + $0x198] sm:$0xff] %v5669_v32 }
  0x9d   : > { %772 = vst [vmem:[#allocation2 + $0x1b8] sm:$0xff] %v5669_v32  ;;  %773 = vst [vmem:[#allocation2 + $0x1d8] sm:$0xff] %v5669_v32 }
  0x9e   : > { %774 = vst [vmem:[#allocation2 + $0x1f8] sm:$0xff] %v5669_v32  ;;  %775 = vst [vmem:[#allocation2 + $0x218] sm:$0xff] %v5669_v32  ;;  %4993 = vmatpush3.bf16.msra.mxu1 %v5965_v37 }
  0x9f   : > { %4467 = vmatpush3.bf16.msra.mxu0 %v5342_v7  ;;  %4986 = vmatprep.subr.bf16.mxu1 %v5969_v38 }
  0xa0   : > { %4468 = vmatprep.subr.bf16.mxu0 %v5343_v8 }
  0xa2   : > { %4994 = vmatpush3.bf16.msra.mxu1 %v5969_v38 }
  0xa3   : > { %4469 = vmatpush3.bf16.msra.mxu0 %v5343_v8  ;;  %4987 = vmatprep.subr.bf16.mxu1 %v5973_v39 }
  0xa4   : > { %4502 = vmatprep.subr.bf16.mxu0 %v5360_v11 }
  0xa6   : > { %4471 = vmatmul.mubr.bf16.vlgmr.msra.gmra.mrb[0].mxu0 %v344_v9  ;;  %4995 = vmatpush3.bf16.msra.mxu1 %v5973_v39 }
  0xa7   : > { %4474 = vmatprep.mubr.bf16.mxu0 %v346_v10  ;;  %4503 = vmatpush3.bf16.msra.mxu0 %v5360_v11 }
  0xa8   : > { %4504 = vmatprep.subr.bf16.mxu0 %v5361_v12  ;;  %4988 = vmatprep.subr.bf16.mxu1 %v5977_v41 }
  0xaa   : > { %4996 = vmatpush3.bf16.msra.mxu1 %v5977_v41 }
  0xab   : > { %4505 = vmatpush3.bf16.msra.mxu0 %v5361_v12  ;;  %4989 = vmatprep.subr.bf16.mxu1 %v5981_v42  ;;  %v5382_v12 = vld [vmem:[#allocation8 + $0x18] sm:$0xff]  }
  0xac   : > { %4506 = vmatprep.subr.bf16.mxu0 %v5362_v15 }
  0xae   : > { %4475 = vmatmul.mubr.bf16.gmra.mrb[4].mxu0 %v348_v13  ;;  %4997 = vmatpush3.bf16.msra.mxu1 %v5981_v42 }
  0xaf   : > { %4478 = vmatprep.mubr.bf16.mxu0 %v350_v14  ;;  %4507 = vmatpush3.bf16.msra.mxu0 %v5362_v15 }
  0xb0   : > { %4508 = vmatprep.subr.bf16.mxu0 %v5363_v16  ;;  %4694 = vmatprep.subr.bf16.mxu1 %v5985_v43 }
  0xb3   : > { %4509 = vmatpush3.bf16.msra.mxu0 %v5363_v16 }
  0xb4   : > { %4510 = vmatprep.subr.bf16.mxu0 %v5364_v28 }
  0xb6   : > { %4479 = vmatmul.mubr.bf16.gmra.mrb[8].mxu0 %v352_v17 }
  0xb7   : > { %4482 = vmatprep.mubr.bf16.mxu0 %v354_v18  ;;  %4511 = vmatpush3.bf16.msra.mxu0 %v5364_v28  ;;  %v5386_v28 = vld [vmem:[#allocation8 + $0x28] sm:$0xff]  }
  0xb8   : > { %4512 = vmatprep.subr.bf16.mxu0 %v5365_v29 }
  0xbb   : > { %4513 = vmatpush3.bf16.msra.mxu0 %v5365_v29 }
  0xbc   : > { %4514 = vmatprep.subr.bf16.mxu0 %v5366_v30 }
  0xbe   : > { %4483 = vmatmul.mubr.bf16.gmra.mrb[12].mxu0 %v356_v19 }
  0xbf   : > { %4486 = vmatprep.mubr.bf16.mxu0 %v358_v20  ;;  %4515 = vmatpush3.bf16.msra.mxu0 %v5366_v30 }
  0xc0   : > { %4516 = vmatprep.subr.bf16.mxu0 %v5367_v31 }
  0xc3   : > { %4517 = vmatpush3.bf16.msra.mxu0 %v5367_v31 }
  0xc4   : > { %4550 = vmatprep.subr.bf16.mxu0 %v5376_v40 }
  0xc6   : > { %4487 = vmatmul.mubr.bf16.gmra.mrb[16].mxu0 %v360_v21 }
  0xc7   : > { %4490 = vmatprep.mubr.bf16.mxu0 %v362_v22  ;;  %v5384_v22 = vld [vmem:[#allocation8 + $0x20] sm:$0xff]  }
  0xce   : > { %4491 = vmatmul.mubr.bf16.gmra.mrb[20].mxu0 %v364_v23 }
  0xcf   : > { %4494 = vmatprep.mubr.bf16.mxu0 %v366_v24 }
  0xd6   : > { %4495 = vmatmul.mubr.bf16.gmra.mrb[24].mxu0 %v368_v25 }
  0xd7   : > { %4498 = vmatprep.mubr.bf16.mxu0 %v370_v26 }
  0xde   : > { %4499 = vmatmul.mubr.bf16.gmra.mrb[28].mxu0 %v372_v27 }
  0xdf   : > { %4518 = vmatprep.mubr.bf16.mxu0 %v5670_v33 }
 0x179   : > { %v4472_v45 = vpop.f32.mrb[0].mxu0 }
 0x17a   : > { %v584_v46 = vadd.f32 %v4472_v45, %v5991_v44  ;;  %v575_v47 = vpop.f32.mrb[1].mxu0 }
 0x17b   : > { %v576_v48 = vadd.f32 %v5991_v44, %v575_v47  ;;  %v4473_v49 = vpop.f32.mrb[2].mxu0 }
 0x17c   : > { %v704_v50 = vmax.f32 %v584_v46, 0.0  ;;  %v587_v51 = vadd.f32 %v4473_v49, %v5991_v44  ;;  %v578_v52 = vpop.f32.mrb[3].mxu0 }
 0x17d   : > { %v702_v53 = vmax.f32 %v576_v48, 0.0  ;;  %v579_v54 = vadd.f32 %v5991_v44, %v578_v52  ;;  %v5388_v48 = vld [vmem:[#allocation8 + $0x30] sm:$0xff]  }
 0x17e   : > { %778 = vst [vmem:[#allocation2 + $0x48] sm:$0xff] %v704_v50  ;;  %v705_v55 = vmax.f32 %v587_v51, 0.0 }
 0x17f   : > { %776 = vst [vmem:[#allocation2 + $0x28] sm:$0xff] %v702_v53  ;;  %v703_v56 = vmax.f32 %v579_v54, 0.0  ;;  %v5390_v54 = vld [vmem:[#allocation8 + $0x38] sm:$0xff]  }
 0x180   : > { %779 = vst [vmem:[#allocation2 + $0x50] sm:$0xff] %v705_v55  ;;  %v5997_v57 = vpack.c.bf16 %v705_v55, %v704_v50 }
 0x181   : > { %777 = vst [vmem:[#allocation2 + $0x30] sm:$0xff] %v703_v56  ;;  %v4476_v58 = vpop.f32.mrb[4].mxu0  ;;  %v5999_v59 = vpack.c.bf16 %v703_v56, %v702_v53 }
 0x182   : > { %v600_v61 = vadd.f32 %v4476_v58, %v5991_v44  ;;  %v591_v62 = vpop.f32.mrb[5].mxu0 }
 0x183   : > { %v592_v63 = vadd.f32 %v5991_v44, %v591_v62  ;;  %v4477_v0 = vpop.f32.mrb[6].mxu0  ;;  %4519 = vmatmul.mubr.bf16.vlgmr.msra.gmra.mrb[32].mxu0 %v5999_v59 }
 0x184   : > { %v708_v1 = vmax.f32 %v600_v61, 0.0  ;;  %v603_v2 = vadd.f32 %v4477_v0, %v5991_v44  ;;  %v594_v3 = vpop.f32.mrb[7].mxu0  ;;  %4522 = vmatprep.mubr.bf16.mxu0 %v5997_v57  ;;  %4551 = vmatpush3.bf16.msra.mxu0 %v5376_v40 }
 0x185   : > { %v706_v4 = vmax.f32 %v592_v63, 0.0  ;;  %v595_v5 = vadd.f32 %v5991_v44, %v594_v3  ;;  %4552 = vmatprep.subr.bf16.mxu0 %v5378_v60 }
 0x186   : > { %782 = vst [vmem:[#allocation2 + $0x88] sm:$0xff] %v708_v1  ;;  %v709_v7 = vmax.f32 %v603_v2, 0.0  ;;  %v6037_v2 = vld [vmem:[#allocation8 + $0x80] sm:$0xff]  }
 0x187   : > { %780 = vst [vmem:[#allocation2 + $0x68] sm:$0xff] %v706_v4  ;;  %v707_v8 = vmax.f32 %v595_v5, 0.0 }
 0x188   : > { %783 = vst [vmem:[#allocation2 + $0x90] sm:$0xff] %v709_v7  ;;  %v6007_v9 = vpack.c.bf16 %v709_v7, %v708_v1  ;;  %4553 = vmatpush3.bf16.msra.mxu0 %v5378_v60 }
 0x189   : > { %781 = vst [vmem:[#allocation2 + $0x70] sm:$0xff] %v707_v8  ;;  %v4480_v10 = vpop.f32.mrb[8].mxu0  ;;  %v6009_v11 = vpack.c.bf16 %v707_v8, %v706_v4  ;;  %4554 = vmatprep.subr.bf16.mxu0 %v5380_v6 }
 0x18a   : > { %v616_v13 = vadd.f32 %v4480_v10, %v5991_v44  ;;  %v607_v14 = vpop.f32.mrb[9].mxu0 }
 0x18b   : > { %v608_v15 = vadd.f32 %v5991_v44, %v607_v14  ;;  %v4481_v16 = vpop.f32.mrb[10].mxu0  ;;  %4523 = vmatmul.mubr.bf16.gmra.mrb[36].mxu0 %v6009_v11 }
 0x18c   : > { %v712_v17 = vmax.f32 %v616_v13, 0.0  ;;  %v619_v18 = vadd.f32 %v4481_v16, %v5991_v44  ;;  %v610_v19 = vpop.f32.mrb[11].mxu0  ;;  %4526 = vmatprep.mubr.bf16.mxu0 %v6007_v9  ;;  %4555 = vmatpush3.bf16.msra.mxu0 %v5380_v6 }
 0x18d   : > { %v710_v20 = vmax.f32 %v608_v15, 0.0  ;;  %v611_v21 = vadd.f32 %v5991_v44, %v610_v19  ;;  %4556 = vmatprep.subr.bf16.mxu0 %v5382_v12 }
 0x18e   : > { %786 = vst [vmem:[#allocation2 + $0xc8] sm:$0xff] %v712_v17  ;;  %v713_v23 = vmax.f32 %v619_v18, 0.0 }
 0x18f   : > { %784 = vst [vmem:[#allocation2 + $0xa8] sm:$0xff] %v710_v20  ;;  %v711_v24 = vmax.f32 %v611_v21, 0.0 }
 0x190   : > { %787 = vst [vmem:[#allocation2 + $0xd0] sm:$0xff] %v713_v23  ;;  %v6017_v25 = vpack.c.bf16 %v713_v23, %v712_v17  ;;  %4557 = vmatpush3.bf16.msra.mxu0 %v5382_v12 }
 0x191   : > { %785 = vst [vmem:[#allocation2 + $0xb0] sm:$0xff] %v711_v24  ;;  %v4484_v26 = vpop.f32.mrb[12].mxu0  ;;  %v6019_v27 = vpack.c.bf16 %v711_v24, %v710_v20  ;;  %4558 = vmatprep.subr.bf16.mxu0 %v5384_v22 }
 0x192   : > { %v632_v29 = vadd.f32 %v4484_v26, %v5991_v44  ;;  %v623_v30 = vpop.f32.mrb[13].mxu0 }
 0x193   : > { %v624_v31 = vadd.f32 %v5991_v44, %v623_v30  ;;  %v4485_v32 = vpop.f32.mrb[14].mxu0  ;;  %4527 = vmatmul.mubr.bf16.gmra.mrb[40].mxu0 %v6019_v27 }
 0x194   : > { %v716_v33 = vmax.f32 %v632_v29, 0.0  ;;  %v635_v40 = vadd.f32 %v4485_v32, %v5991_v44  ;;  %v626_v45 = vpop.f32.mrb[15].mxu0  ;;  %4530 = vmatprep.mubr.bf16.mxu0 %v6017_v25  ;;  %4559 = vmatpush3.bf16.msra.mxu0 %v5384_v22 }
 0x195   : > { %v714_v46 = vmax.f32 %v624_v31, 0.0  ;;  %v627_v47 = vadd.f32 %v5991_v44, %v626_v45  ;;  %4560 = vmatprep.subr.bf16.mxu0 %v5386_v28 }
 0x196   : > { %790 = vst [vmem:[#allocation2 + $0x108] sm:$0xff] %v716_v33  ;;  %v717_v49 = vmax.f32 %v635_v40, 0.0  ;;  %v5379_v40 = vld [vmem:[#allocation8 + $0x108] sm:$0xff]  }
 0x197   : > { %788 = vst [vmem:[#allocation2 + $0xe8] sm:$0xff] %v714_v46  ;;  %v715_v50 = vmax.f32 %v627_v47, 0.0 }
 0x198   : > { %791 = vst [vmem:[#allocation2 + $0x110] sm:$0xff] %v717_v49  ;;  %v6027_v51 = vpack.c.bf16 %v717_v49, %v716_v33  ;;  %4561 = vmatpush3.bf16.msra.mxu0 %v5386_v28 }
 0x199   : > { %789 = vst [vmem:[#allocation2 + $0xf0] sm:$0xff] %v715_v50  ;;  %v4488_v52 = vpop.f32.mrb[16].mxu0  ;;  %v6029_v53 = vpack.c.bf16 %v715_v50, %v714_v46  ;;  %4562 = vmatprep.subr.bf16.mxu0 %v5388_v48 }
 0x19a   : > { %v648_v55 = vadd.f32 %v4488_v52, %v5991_v44  ;;  %v639_v56 = vpop.f32.mrb[17].mxu0 }
 0x19b   : > { %v640_v58 = vadd.f32 %v5991_v44, %v639_v56  ;;  %v4489_v60 = vpop.f32.mrb[18].mxu0  ;;  %4531 = vmatmul.mubr.bf16.gmra.mrb[44].mxu0 %v6029_v53 }
 0x19c   : > { %v720_v61 = vmax.f32 %v648_v55, 0.0  ;;  %v651_v62 = vadd.f32 %v4489_v60, %v5991_v44  ;;  %v642_v63 = vpop.f32.mrb[19].mxu0  ;;  %4534 = vmatprep.mubr.bf16.mxu0 %v6027_v51  ;;  %4563 = vmatpush3.bf16.msra.mxu0 %v5388_v48  ;;  %v5381_v55 = vld [vmem:[#allocation8 + $0x110] sm:$0xff]  }
 0x19d   : > { %v718_v0 = vmax.f32 %v640_v58, 0.0  ;;  %v643_v1 = vadd.f32 %v5991_v44, %v642_v63  ;;  %4564 = vmatprep.subr.bf16.mxu0 %v5390_v54 }
 0x19e   : > { %794 = vst [vmem:[#allocation2 + $0x148] sm:$0xff] %v720_v61  ;;  %v721_v3 = vmax.f32 %v651_v62, 0.0 }
 0x19f   : > { %792 = vst [vmem:[#allocation2 + $0x128] sm:$0xff] %v718_v0  ;;  %v719_v4 = vmax.f32 %v643_v1, 0.0 }
 0x1a0   : > { %795 = vst [vmem:[#allocation2 + $0x150] sm:$0xff] %v721_v3  ;;  %v6039_v5 = vpack.c.bf16 %v721_v3, %v720_v61  ;;  %4565 = vmatpush3.bf16.msra.mxu0 %v5390_v54 }
 0x1a1   : > { %793 = vst [vmem:[#allocation2 + $0x130] sm:$0xff] %v719_v4  ;;  %v4492_v6 = vpop.f32.mrb[20].mxu0  ;;  %v6041_v7 = vpack.c.bf16 %v719_v4, %v718_v0  ;;  %4598 = vmatprep.subr.bf16.mxu0 %v6037_v2 }
 0x1a2   : > { %v664_v8 = vadd.f32 %v4492_v6, %v5991_v44  ;;  %v655_v10 = vpop.f32.mrb[21].mxu0 }
 0x1a3   : > { %v656_v12 = vadd.f32 %v5991_v44, %v655_v10  ;;  %v4493_v13 = vpop.f32.mrb[22].mxu0  ;;  %4535 = vmatmul.mubr.bf16.gmra.mrb[48].mxu0 %v6041_v7 }
 0x1a4   : > { %v724_v14 = vmax.f32 %v664_v8, 0.0  ;;  %v667_v15 = vadd.f32 %v4493_v13, %v5991_v44  ;;  %v658_v16 = vpop.f32.mrb[23].mxu0  ;;  %4538 = vmatprep.mubr.bf16.mxu0 %v6039_v5  ;;  %v5383_v8 = vld [vmem:[#allocation8 + $0x118] sm:$0xff]  }
 0x1a5   : > { %v722_v17 = vmax.f32 %v656_v12, 0.0  ;;  %v659_v18 = vadd.f32 %v5991_v44, %v658_v16  ;;  %v1679_v29 = vld [vmem:[#allocation2 + $0x147] sm:$0xff] }
 0x1a6   : > { %798 = vst [vmem:[#allocation2 + $0x188] sm:$0xff] %v724_v14  ;;  %v725_v19 = vmax.f32 %v667_v15, 0.0  ;;  %v1677_v22 = vld [vmem:[#allocation2 + $0x127] sm:$0xff] }
 0x1a7   : > { %796 = vst [vmem:[#allocation2 + $0x168] sm:$0xff] %v722_v17  ;;  %v723_v20 = vmax.f32 %v659_v18, 0.0  ;;  %v1680_v21 = vld [vmem:[#allocation2 + $0x14f] sm:$0xff]  ;;  %v808_v18 = vld [vmem:[#allocation2 + $0x7] sm:$0xff] }
 0x1a8   : > { %799 = vst [vmem:[#allocation2 + $0x190] sm:$0xff] %v725_v19  ;;  %v1678_v23 = vld [vmem:[#allocation2 + $0x12f] sm:$0xff]  ;;  %v6050_v24 = vpack.c.bf16 %v725_v19, %v724_v14  ;;  %v6057_v33 = vpack.c.bf16 %v1680_v21, %v1679_v29  ;;  %v5385_v21 = vld [vmem:[#allocation8 + $0x120] sm:$0xff]  }
 0x1a9   : > { %797 = vst [vmem:[#allocation2 + $0x170] sm:$0xff] %v723_v20  ;;  %v4496_v26 = vpop.f32.mrb[24].mxu0  ;;  %v6052_v28 = vpack.c.bf16 %v1678_v23, %v1677_v22  ;;  %v6054_v30 = vpack.c.bf16 %v723_v20, %v722_v17  ;;  %v809_v19 = vld [vmem:[#allocation2 + $0xf] sm:$0xff] }
 0x1aa   : > { %v680_v31 = vadd.f32 %v4496_v26, %v5991_v44  ;;  %v671_v32 = vpop.f32.mrb[25].mxu0 }
 0x1ab   : > { %v672_v45 = vadd.f32 %v5991_v44, %v671_v32  ;;  %v4497_v46 = vpop.f32.mrb[26].mxu0  ;;  %4678 = vmatprep.mubr.bf16.mxu1 %v6052_v28  ;;  %4539 = vmatmul.mubr.bf16.gmra.mrb[52].mxu0 %v6054_v30 }
 0x1ac   : > { %v728_v47 = vmax.f32 %v680_v31, 0.0  ;;  %v683_v48 = vadd.f32 %v4497_v46, %v5991_v44  ;;  %v674_v49 = vpop.f32.mrb[27].mxu0  ;;  %4679 = vmatmul.mubr.bf16.vlgmr.msra.gmra.mrb[0].mxu1 %v6057_v33  ;;  %4542 = vmatprep.mubr.bf16.mxu0 %v6050_v24  ;;  %v840_v31 = vpack.c.bf16 %v809_v19, %v808_v18  ;;  %v5393_v18 = vld [vmem:[#allocation8 + $0x148] sm:$0xff]  }
 0x1ad   : > { %v726_v50 = vmax.f32 %v672_v45, 0.0  ;;  %v675_v52 = vadd.f32 %v5991_v44, %v674_v49  ;;  %4695 = vmatpush3.bf16.msra.mxu1 %v5985_v43  ;;  %v1683_v1 = vld [vmem:[#allocation2 + $0x187] sm:$0xff]  ;;  %v811_v49 = vld [vmem:[#allocation2 + $0x2f] sm:$0xff] }
 0x1ae   : > { %802 = vst [vmem:[#allocation2 + $0x1c8] sm:$0xff] %v728_v47  ;;  %v729_v54 = vmax.f32 %v683_v48, 0.0  ;;  %4696 = vmatprep.subr.bf16.mxu1 %v5379_v40  ;;  %v1681_v60 = vld [vmem:[#allocation2 + $0x167] sm:$0xff]  ;;  %v5389_v48 = vld [vmem:[#allocation8 + $0x130] sm:$0xff]  }
 0x1af   : > { %800 = vst [vmem:[#allocation2 + $0x1a8] sm:$0xff] %v726_v50  ;;  %v727_v56 = vmax.f32 %v675_v52, 0.0  ;;  %v1684_v58 = vld [vmem:[#allocation2 + $0x18f] sm:$0xff] }
 0x1b0   : > { %803 = vst [vmem:[#allocation2 + $0x1d0] sm:$0xff] %v729_v54  ;;  %v1682_v61 = vld [vmem:[#allocation2 + $0x16f] sm:$0xff]  ;;  %v6067_v62 = vpack.c.bf16 %v729_v54, %v728_v47  ;;  %v6074_v6 = vpack.c.bf16 %v1684_v58, %v1683_v1 }
 0x1b1   : > { %801 = vst [vmem:[#allocation2 + $0x1b0] sm:$0xff] %v727_v56  ;;  %4697 = vmatpush3.bf16.msra.mxu1 %v5379_v40  ;;  %v4500_v63 = vpop.f32.mrb[28].mxu0  ;;  %v6069_v0 = vpack.c.bf16 %v1682_v61, %v1681_v60  ;;  %v6071_v3 = vpack.c.bf16 %v727_v56, %v726_v50  ;;  %v5387_v47 = vld [vmem:[#allocation8 + $0x128] sm:$0xff]  }
 0x1b2   : > { %v696_v43 = vadd.f32 %v4500_v63, %v5991_v44  ;;  %v687_v4 = vpop.f32.mrb[29].mxu0  ;;  %4698 = vmatprep.subr.bf16.mxu1 %v5381_v55  ;;  %v813_v52 = vld [vmem:[#allocation2 + $0x4f] sm:$0xff]  ;;  %v810_v56 = vld [vmem:[#allocation2 + $0x27] sm:$0xff] }
 0x1b3   : > { %v688_v10 = vadd.f32 %v5991_v44, %v687_v4  ;;  %v4501_v12 = vpop.f32.mrb[30].mxu0  ;;  %4682 = vmatprep.mubr.bf16.mxu1 %v6069_v0  ;;  %4543 = vmatmul.mubr.bf16.gmra.mrb[56].mxu0 %v6071_v3  ;;  %v6096_v61 = vpack.c.bf16 %v811_v49, %v810_v56  ;;  %v812_v63 = vld [vmem:[#allocation2 + $0x47] sm:$0xff]  ;;  %v5405_v49 = vld [vmem:[#allocation8 + $0xb0] sm:$0xff]  }
 0x1b4   : > { %v732_v13 = vmax.f32 %v696_v43, 0.0  ;;  %v699_v14 = vadd.f32 %v4501_v12, %v5991_v44  ;;  %v690_v15 = vpop.f32.mrb[31].mxu0  ;;  %4683 = vmatmul.mubr.bf16.gmra.mrb[4].mxu1 %v6074_v6  ;;  %4546 = vmatprep.mubr.bf16.mxu0 %v6067_v62  ;;  %v5391_v43 = vld [vmem:[#allocation8 + $0x138] sm:$0xff]   ;;  %v6098_v4 = vpack.c.bf16 %v813_v52, %v812_v63  ;;  %v815_v12 = vld [vmem:[#allocation2 + $0x6f] sm:$0xff] }
 0x1b5   : > { %v730_v16 = vmax.f32 %v688_v10, 0.0  ;;  %v691_v17 = vadd.f32 %v5991_v44, %v690_v15  ;;  %4699 = vmatpush3.bf16.msra.mxu1 %v5381_v55  ;;  %v1687_v44 = vld [vmem:[#allocation2 + $0x1c7] sm:$0xff]  ;;  %v5403_v56 = vld [vmem:[#allocation8 + $0x170] sm:$0xff]  }
 0x1b6   : > { %806 = vst [vmem:[#allocation2 + $0x208] sm:$0xff] %v732_v13  ;;  %v733_v20 = vmax.f32 %v699_v14, 0.0  ;;  %4700 = vmatprep.subr.bf16.mxu1 %v5383_v8  ;;  %v1685_v26 = vld [vmem:[#allocation2 + $0x1a7] sm:$0xff]  ;;  %v5399_v14 = vld [vmem:[#allocation8 + $0x90] sm:$0xff]  }
 0x1b7   : > { %804 = vst [vmem:[#allocation2 + $0x1e8] sm:$0xff] %v730_v16  ;;  %v731_v22 = vmax.f32 %v691_v17, 0.0  ;;  %v1688_v23 = vld [vmem:[#allocation2 + $0x1cf] sm:$0xff]  ;;  %v5392_v10 = vld [vmem:[#allocation8 + $0x140] sm:$0xff]  }
 0x1b8   : > { %807 = vst [vmem:[#allocation2 + $0x210] sm:$0xff] %v733_v20  ;;  %v1686_v29 = vld [vmem:[#allocation2 + $0x1af] sm:$0xff]  ;;  %v6083_v32 = vpack.c.bf16 %v733_v20, %v732_v13  ;;  %v6089_v46 = vpack.c.bf16 %v1688_v23, %v1687_v44  ;;  %v814_v15 = vld [vmem:[#allocation2 + $0x67] sm:$0xff] }
 0x1b9   : > { %805 = vst [vmem:[#allocation2 + $0x1f0] sm:$0xff] %v731_v22  ;;  %4701 = vmatpush3.bf16.msra.mxu1 %v5383_v8  ;;  %v6085_v40 = vpack.c.bf16 %v1686_v29, %v1685_v26  ;;  %v6087_v45 = vpack.c.bf16 %v731_v22, %v730_v16  ;;  %v5398_v8 = vld [vmem:[#allocation8 + $0x88] sm:$0xff]   ;;  %v6105_v16 = vpack.c.bf16 %v815_v12, %v814_v15  ;;  %v5394_v20 = vld [vmem:[#allocation8 + $0x150] sm:$0xff]   ;;  %v5402_v22 = vld [vmem:[#allocation8 + $0xa0] sm:$0xff]  }
 0x1ba   : > { %4702 = vmatprep.subr.bf16.mxu1 %v5385_v21  ;;  %v817_v13 = vld [vmem:[#allocation2 + $0x8f] sm:$0xff]  ;;  %v816_v17 = vld [vmem:[#allocation2 + $0x87] sm:$0xff] }
 0x1bb   : > { %4686 = vmatprep.mubr.bf16.mxu1 %v6085_v40  ;;  %4547 = vmatmul.mubr.bf16.gmra.mrb[60].mxu0 %v6087_v45  ;;  %v6107_v19 = vpack.c.bf16 %v817_v13, %v816_v17  ;;  %v818_v23 = vld [vmem:[#allocation2 + $0xa7] sm:$0xff]  ;;  %v823_v44 = vld [vmem:[#allocation2 + $0xef] sm:$0xff] }
 0x1bc   : > { %4687 = vmatmul.mubr.bf16.gmra.mrb[8].mxu1 %v6089_v46  ;;  %4566 = vmatprep.mubr.bf16.mxu0 %v840_v31  ;;  %v820_v29 = vld [vmem:[#allocation2 + $0xc7] sm:$0xff]  ;;  %v5410_v63 = vld [vmem:[#allocation8 + $0x190] sm:$0xff]  }
 0x1bd   : > { %4703 = vmatpush3.bf16.msra.mxu1 %v5385_v21  ;;  %v1691_v60 = vld [vmem:[#allocation2 + $0x207] sm:$0xff]  ;;  %v821_v21 = vld [vmem:[#allocation2 + $0xcf] sm:$0xff] }
 0x1be   : > { %4704 = vmatprep.subr.bf16.mxu1 %v5387_v47  ;;  %v1689_v54 = vld [vmem:[#allocation2 + $0x1e7] sm:$0xff]  ;;  %v6115_v31 = vpack.c.bf16 %v821_v21, %v820_v29  ;;  %v2286_v12 = vld [vmem:[#allocation2 + $0xf1] sm:$0xff] }
 0x1bf   : > { %v1692_v50 = vld [vmem:[#allocation2 + $0x20f] sm:$0xff]  ;;  %v5412_v13 = vld [vmem:[#allocation8 + $0x1a0] sm:$0xff]  }
 0x1c0   : > { %v1690_v55 = vld [vmem:[#allocation2 + $0x1ef] sm:$0xff]  ;;  %v1708_v1 = vpack.c.bf16 %v1692_v50, %v1691_v60  ;;  %v822_v50 = vld [vmem:[#allocation2 + $0xe7] sm:$0xff]  ;;  %v5406_v60 = vld [vmem:[#allocation8 + $0x178] sm:$0xff]  }
 0x1c1   : > { %4705 = vmatpush3.bf16.msra.mxu1 %v5387_v47  ;;  %v6094_v58 = vpack.c.bf16 %v1690_v55, %v1689_v54  ;;  %v5397_v47 = vld [vmem:[#allocation8 + $0x160] sm:$0xff]   ;;  %v6121_v52 = vpack.c.bf16 %v823_v44, %v822_v50  ;;  %v1372_v15 = vld [vmem:[#allocation2 + $0x111] sm:$0xff]  ;;  %v1383_v50 = vld [vmem:[#allocation2 + $0x1c9] sm:$0xff] }
 0x1c2   : > { %4706 = vmatprep.subr.bf16.mxu1 %v5389_v48  ;;  %v824_v54 = vld [vmem:[#allocation2 + $0x107] sm:$0xff]  ;;  %v1376_v21 = vld [vmem:[#allocation2 + $0x151] sm:$0xff] }
 0x1c3   : > { %4690 = vmatprep.mubr.bf16.mxu1 %v6094_v58  ;;  %4567 = vmatmul.mubr.bf16.vlgmr.msra.gmra.mrb[32].mxu0 %v6096_v61  ;;  %v2294_v29 = vld [vmem:[#allocation2 + $0x171] sm:$0xff] }
 0x1c4   : > { %4691 = vmatmul.mubr.bf16.gmra.mrb[12].mxu1 %v1708_v1  ;;  %4570 = vmatprep.mubr.bf16.mxu0 %v6098_v4  ;;  %v1368_v1 = vld [vmem:[#allocation2 + $0xd1] sm:$0xff] }
 0x1c5   : > { %4707 = vmatpush3.bf16.msra.mxu1 %v5389_v48  ;;  %4710 = vmatprep.mubr.bf16.mxu1 %v5999_v59  ;;  %v5401_v59 = vld [vmem:[#allocation8 + $0x98] sm:$0xff]   ;;  %v825_v48 = vld [vmem:[#allocation2 + $0x10f] sm:$0xff] }
 0x1c6   : > { %4708 = vmatprep.subr.bf16.mxu1 %v5391_v43  ;;  %4599 = vmatpush3.bf16.msra.mxu0 %v6037_v2  ;;  %v819_v2 = vld [vmem:[#allocation2 + $0xaf] sm:$0xff]  ;;  %v6123_v55 = vpack.c.bf16 %v825_v48, %v824_v54 }
 0x1c7   : > { %4600 = vmatprep.subr.bf16.mxu0 %v5398_v8  ;;  %v6113_v26 = vpack.c.bf16 %v819_v2, %v818_v23  ;;  %v5414_v2 = vld [vmem:[#allocation8 + $0x1b0] sm:$0xff]   ;;  %v5415_v23 = vld [vmem:[#allocation8 + $0x1b8] sm:$0xff]  }
 0x1c8   : > { %v1380_v44 = vld [vmem:[#allocation2 + $0x191] sm:$0xff] }
 0x1c9   : > { %4709 = vmatpush3.bf16.msra.mxu1 %v5391_v43  ;;  %v1384_v54 = vld [vmem:[#allocation2 + $0x1d1] sm:$0xff] }
 0x1ca   : > { %4742 = vmatprep.subr.bf16.mxu1 %v5392_v10  ;;  %4601 = vmatpush3.bf16.msra.mxu0 %v5398_v8 }
 0x1cb   : > { %4571 = vmatmul.mubr.bf16.gmra.mrb[36].mxu0 %v6105_v16  ;;  %4602 = vmatprep.subr.bf16.mxu0 %v5399_v14 }
 0x1cc   : > { %4711 = vmatmul.mubr.bf16.vlgmr.msra.gmra.mrb[16].mxu1 %v5997_v57  ;;  %4574 = vmatprep.mubr.bf16.mxu0 %v6107_v19  ;;  %v5395_v57 = vld [vmem:[#allocation8 + $0x158] sm:$0xff]  }
 0x1cd   : > { %4743 = vmatpush3.bf16.msra.mxu1 %v5392_v10  ;;  %4714 = vmatprep.mubr.bf16.mxu1 %v6009_v11  ;;  %v5404_v11 = vld [vmem:[#allocation8 + $0xa8] sm:$0xff]   ;;  %v5411_v10 = vld [vmem:[#allocation8 + $0x198] sm:$0xff]  }
 0x1ce   : > { %4744 = vmatprep.subr.bf16.mxu1 %v5393_v18  ;;  %4603 = vmatpush3.bf16.msra.mxu0 %v5399_v14  ;;  %v1371_v14 = vld [vmem:[#allocation2 + $0x109] sm:$0xff] }
 0x1cf   : > { %4604 = vmatprep.subr.bf16.mxu0 %v5401_v59  ;;  %v6177_v17 = vpack.c.bf16 %v1372_v15, %v1371_v14  ;;  %v2609_v14 = vld [vmem:[#allocation2 + $0x20f] sm:$0xff]  ;;  %v2606_v15 = vld [vmem:[#allocation2 + $0x1e7] sm:$0xff] }
 0x1d1   : > { %4745 = vmatpush3.bf16.msra.mxu1 %v5393_v18  ;;  %v5413_v18 = vld [vmem:[#allocation8 + $0x1a8] sm:$0xff]  }
 0x1d2   : > { %4746 = vmatprep.subr.bf16.mxu1 %v5394_v20  ;;  %4605 = vmatpush3.bf16.msra.mxu0 %v5401_v59  ;;  %v2290_v59 = vld [vmem:[#allocation2 + $0x131] sm:$0xff] }
 0x1d3   : > { %4575 = vmatmul.mubr.bf16.gmra.mrb[40].mxu0 %v6113_v26  ;;  %4606 = vmatprep.subr.bf16.mxu0 %v5402_v22 }
 0x1d4   : > { %4715 = vmatmul.mubr.bf16.gmra.mrb[20].mxu1 %v6007_v9  ;;  %4578 = vmatprep.mubr.bf16.mxu0 %v6115_v31  ;;  %v5400_v9 = vld [vmem:[#allocation8 + $0x168] sm:$0xff]  }
 0x1d5   : > { %4718 = vmatprep.mubr.bf16.mxu1 %v6019_v27  ;;  %4747 = vmatpush3.bf16.msra.mxu1 %v5394_v20  ;;  %v5407_v27 = vld [vmem:[#allocation8 + $0xb8] sm:$0xff]   ;;  %v1375_v20 = vld [vmem:[#allocation2 + $0x149] sm:$0xff] }
 0x1d6   : > { %4748 = vmatprep.subr.bf16.mxu1 %v5395_v57  ;;  %4607 = vmatpush3.bf16.msra.mxu0 %v5402_v22  ;;  %v6189_v22 = vpack.c.bf16 %v1376_v21, %v1375_v20  ;;  %v2611_v20 = vld [vmem:[#allocation2 + $0x22f] sm:$0xff] }
 0x1d7   : > { %4608 = vmatprep.subr.bf16.mxu0 %v5404_v11 }
 0x1d9   : > { %4749 = vmatpush3.bf16.msra.mxu1 %v5395_v57  ;;  %v5416_v57 = vld [vmem:[#allocation8 + $0x1c0] sm:$0xff]  }
 0x1da   : > { %4750 = vmatprep.subr.bf16.mxu1 %v5397_v47  ;;  %4609 = vmatpush3.bf16.msra.mxu0 %v5404_v11  ;;  %v1379_v11 = vld [vmem:[#allocation2 + $0x189] sm:$0xff] }
 0x1db   : > { %4579 = vmatmul.mubr.bf16.gmra.mrb[44].mxu0 %v6121_v52  ;;  %4610 = vmatprep.subr.bf16.mxu0 %v5405_v49  ;;  %v6198_v48 = vpack.c.bf16 %v1380_v44, %v1379_v11  ;;  %v2891_v11 = vld [vmem:[#allocation2 + $0x90] sm:$0xff]  ;;  %v2888_v44 = vld [vmem:[#allocation2 + $0x68] sm:$0xff] }
 0x1dc   : > { %4719 = vmatmul.mubr.bf16.gmra.mrb[24].mxu1 %v6017_v25  ;;  %4582 = vmatprep.mubr.bf16.mxu0 %v6123_v55  ;;  %v5408_v25 = vld [vmem:[#allocation8 + $0x180] sm:$0xff]  }
 0x1dd   : > { %4722 = vmatprep.mubr.bf16.mxu1 %v6029_v53  ;;  %4751 = vmatpush3.bf16.msra.mxu1 %v5397_v47  ;;  %v1356_v53 = vld [vmem:[#allocation2 + $0x11] sm:$0xff] }
 0x1de   : > { %4752 = vmatprep.subr.bf16.mxu1 %v5400_v9  ;;  %4611 = vmatpush3.bf16.msra.mxu0 %v5405_v49  ;;  %v2298_v49 = vld [vmem:[#allocation2 + $0x1b1] sm:$0xff] }
 0x1df   : > { %4612 = vmatprep.subr.bf16.mxu0 %v5407_v27 }
 0x1e1   : > { %4753 = vmatpush3.bf16.msra.mxu1 %v5400_v9 }
 0x1e2   : > { %4754 = vmatprep.subr.bf16.mxu1 %v5403_v56  ;;  %4613 = vmatpush3.bf16.msra.mxu0 %v5407_v27  ;;  %v6206_v27 = vpack.c.bf16 %v1384_v54, %v1383_v50  ;;  %v5425_v50 = vld [vmem:[#allocation8 + $0x208] sm:$0xff]  }
 0x1e3   : > { %4583 = vmatmul.mubr.bf16.gmra.mrb[48].mxu0 %v6052_v28  ;;  %4646 = vmatprep.subr.bf16.mxu0 %v5953_v34  ;;  %v2274_v28 = vld [vmem:[#allocation2 + $0x31] sm:$0xff] }
 0x1e4   : > { %4723 = vmatmul.mubr.bf16.gmra.mrb[28].mxu1 %v6027_v51  ;;  %4586 = vmatprep.mubr.bf16.mxu0 %v6057_v33  ;;  %v1355_v51 = vld [vmem:[#allocation2 + $0x9] sm:$0xff]  ;;  %v1360_v33 = vld [vmem:[#allocation2 + $0x51] sm:$0xff] }
 0x1e5   : > { %4726 = vmatprep.mubr.bf16.mxu1 %v6041_v7  ;;  %4755 = vmatpush3.bf16.msra.mxu1 %v5403_v56  ;;  %v1387_v7 = vpack.c.bf16 %v1356_v53, %v1355_v51  ;;  %v2301_v56 = vld [vmem:[#allocation2 + $0x1e9] sm:$0xff]  ;;  %v2304_v53 = vld [vmem:[#allocation2 + $0x211] sm:$0xff] }
 0x1e6   : > { %4756 = vmatprep.subr.bf16.mxu1 %v5406_v60  ;;  %v2303_v51 = vld [vmem:[#allocation2 + $0x209] sm:$0xff] }
 0x1e9   : > { %4757 = vmatpush3.bf16.msra.mxu1 %v5406_v60  ;;  %v2302_v60 = vld [vmem:[#allocation2 + $0x1f1] sm:$0xff] }
 0x1ea   : > { %4790 = vmatprep.subr.bf16.mxu1 %v5408_v25 }
 0x1eb   : > { %4587 = vmatmul.mubr.bf16.gmra.mrb[52].mxu0 %v6069_v0 }
 0x1ec   : > { %4727 = vmatmul.mubr.bf16.gmra.mrb[0].mxu1 %v6039_v5  ;;  %4590 = vmatprep.mubr.bf16.mxu0 %v6074_v6  ;;  %v2273_v5 = vld [vmem:[#allocation2 + $0x29] sm:$0xff] }
 0x1ed   : > { %4730 = vmatprep.mubr.bf16.mxu1 %v6054_v30  ;;  %v1359_v30 = vld [vmem:[#allocation2 + $0x49] sm:$0xff]  ;;  %v2305_v0 = vpack.c.bf16 %v2274_v28, %v2273_v5  ;;  %v5419_v28 = vld [vmem:[#allocation8 + $0x1d8] sm:$0xff]  }
 0x1ee   : > { %v1363_v6 = vld [vmem:[#allocation2 + $0x89] sm:$0xff] }
 0x1ef   : > { %v5417_v5 = vld [vmem:[#allocation8 + $0x1c8] sm:$0xff]  }
 0x1f3   : > { %4591 = vmatmul.mubr.bf16.gmra.mrb[56].mxu0 %v6085_v40  ;;  %v1364_v40 = vld [vmem:[#allocation2 + $0x91] sm:$0xff] }
 0x1f4   : > { %4731 = vmatmul.mubr.bf16.gmra.mrb[4].mxu1 %v6050_v24  ;;  %4594 = vmatprep.mubr.bf16.mxu0 %v6089_v46  ;;  %v6145_v24 = vpack.c.bf16 %v1360_v33, %v1359_v30  ;;  %v5409_v46 = vld [vmem:[#allocation8 + $0x188] sm:$0xff]  }
 0x1f5   : > { %4734 = vmatprep.mubr.bf16.mxu1 %v6071_v3  ;;  %v2277_v3 = vld [vmem:[#allocation2 + $0x69] sm:$0xff] }
 0x1f6   : > { %v2597_v30 = vld [vmem:[#allocation2 + $0x14f] sm:$0xff]  ;;  %v2594_v33 = vld [vmem:[#allocation2 + $0x127] sm:$0xff] }
 0x1fb   : > { %4595 = vmatmul.mubr.bf16.gmra.mrb[60].mxu0 %v6094_v58  ;;  %v6154_v58 = vpack.c.bf16 %v1364_v40, %v1363_v6  ;;  %v5424_v6 = vld [vmem:[#allocation8 + $0x200] sm:$0xff]   ;;  %v2601_v40 = vld [vmem:[#allocation2 + $0x18f] sm:$0xff] }
 0x1fc   : > { %4735 = vmatmul.mubr.bf16.gmra.mrb[8].mxu1 %v6067_v62  ;;  %4614 = vmatprep.mubr.bf16.mxu0 %v1387_v7  ;;  %v2278_v62 = vld [vmem:[#allocation2 + $0x71] sm:$0xff]  ;;  %v6218_v7 = vpack.c.bf16 %v2304_v53, %v2303_v51  ;;  %v2892_v53 = vld [vmem:[#allocation2 + $0xa8] sm:$0xff] }
 0x1fd   : > { %4738 = vmatprep.mubr.bf16.mxu1 %v6087_v45  ;;  %v6151_v45 = vpack.c.bf16 %v2278_v62, %v2277_v3  ;;  %v5423_v3 = vld [vmem:[#allocation8 + $0x1f8] sm:$0xff]   ;;  %v2895_v51 = vld [vmem:[#allocation2 + $0xd0] sm:$0xff] }
 0x203   : > { %4615 = vmatmul.mubr.bf16.vlgmr.msra.gmra.mrb[32].mxu0 %v2305_v0 }
 0x204   : > { %4739 = vmatmul.mubr.bf16.gmra.mrb[12].mxu1 %v6083_v32  ;;  %4618 = vmatprep.mubr.bf16.mxu0 %v6145_v24  ;;  %v2282_v32 = vld [vmem:[#allocation2 + $0xb1] sm:$0xff] }
 0x205   : > { %4758 = vmatprep.mubr.bf16.mxu1 %v2305_v0  ;;  %4647 = vmatpush3.bf16.msra.mxu0 %v5953_v34  ;;  %v2281_v34 = vld [vmem:[#allocation2 + $0xa9] sm:$0xff] }
 0x206   : > { %4648 = vmatprep.subr.bf16.mxu0 %v5957_v35  ;;  %v6163_v43 = vpack.c.bf16 %v2282_v32, %v2281_v34  ;;  %v2596_v0 = vld [vmem:[#allocation2 + $0x147] sm:$0xff] }
 0x207   : > { %v2620_v62 = vpack.c.bf16 %v2597_v30, %v2596_v0  ;;  %v2600_v34 = vld [vmem:[#allocation2 + $0x187] sm:$0xff] }
 0x208   : > { %v2622_v32 = vpack.c.bf16 %v2601_v40, %v2600_v34  ;;  %v2896_v30 = vld [vmem:[#allocation2 + $0xe8] sm:$0xff]  ;;  %v5431_v34 = vld [vmem:[#allocation8 + $0x238] sm:$0xff]  }
 0x209   : > { %4649 = vmatpush3.bf16.msra.mxu0 %v5957_v35  ;;  %v1367_v35 = vld [vmem:[#allocation2 + $0xc9] sm:$0xff] }
 0x20a   : > { %4650 = vmatprep.subr.bf16.mxu0 %v5961_v36  ;;  %v6165_v8 = vpack.c.bf16 %v1368_v1, %v1367_v35  ;;  %v2605_v35 = vld [vmem:[#allocation2 + $0x1cf] sm:$0xff]  ;;  %v2602_v1 = vld [vmem:[#allocation2 + $0x1a7] sm:$0xff] }
 0x20b   : > { %4619 = vmatmul.mubr.bf16.gmra.mrb[36].mxu0 %v6151_v45  ;;  %v5429_v0 = vld [vmem:[#allocation8 + $0x228] sm:$0xff]  }
 0x20c   : > { %4759 = vmatmul.mubr.bf16.vlgmr.msra.gmra.mrb[16].mxu1 %v6145_v24  ;;  %4622 = vmatprep.mubr.bf16.mxu0 %v6154_v58  ;;  %v2900_v40 = vld [vmem:[#allocation2 + $0x128] sm:$0xff] }
 0x20d   : > { %4791 = vmatpush3.bf16.msra.mxu1 %v5408_v25  ;;  %4762 = vmatprep.mubr.bf16.mxu1 %v6151_v45  ;;  %v6212_v25 = vpack.c.bf16 %v2302_v60, %v2301_v56  ;;  %v5426_v56 = vld [vmem:[#allocation8 + $0x210] sm:$0xff]  }
 0x20e   : > { %4792 = vmatprep.subr.bf16.mxu1 %v5409_v46  ;;  %4651 = vmatpush3.bf16.msra.mxu0 %v5961_v36  ;;  %v2285_v36 = vld [vmem:[#allocation2 + $0xe9] sm:$0xff] }
 0x20f   : > { %4652 = vmatprep.subr.bf16.mxu0 %v5965_v37  ;;  %v2893_v60 = vld [vmem:[#allocation2 + $0xb0] sm:$0xff] }
 0x211   : > { %4793 = vmatpush3.bf16.msra.mxu1 %v5409_v46 }
 0x212   : > { %4794 = vmatprep.subr.bf16.mxu1 %v5410_v63  ;;  %4653 = vmatpush3.bf16.msra.mxu0 %v5965_v37  ;;  %v6175_v37 = vpack.c.bf16 %v2286_v12, %v2285_v36  ;;  %v2604_v36 = vld [vmem:[#allocation2 + $0x1c7] sm:$0xff] }
 0x213   : > { %4623 = vmatmul.mubr.bf16.gmra.mrb[40].mxu0 %v6163_v43  ;;  %4654 = vmatprep.subr.bf16.mxu0 %v5969_v38  ;;  %v2624_v12 = vpack.c.bf16 %v2605_v35, %v2604_v36  ;;  %v2907_v35 = vld [vmem:[#allocation2 + $0x190] sm:$0xff]  ;;  %v2906_v36 = vld [vmem:[#allocation2 + $0x188] sm:$0xff] }
 0x214   : > { %4763 = vmatmul.mubr.bf16.gmra.mrb[20].mxu1 %v6154_v58  ;;  %4626 = vmatprep.mubr.bf16.mxu0 %v6165_v8 }
 0x215   : > { %4766 = vmatprep.mubr.bf16.mxu1 %v6163_v43  ;;  %4795 = vmatpush3.bf16.msra.mxu1 %v5410_v63  ;;  %v2603_v63 = vld [vmem:[#allocation2 + $0x1af] sm:$0xff] }
 0x216   : > { %4796 = vmatprep.subr.bf16.mxu1 %v5411_v10  ;;  %4655 = vmatpush3.bf16.msra.mxu0 %v5969_v38  ;;  %v2289_v38 = vld [vmem:[#allocation2 + $0x129] sm:$0xff] }
 0x217   : > { %4656 = vmatprep.subr.bf16.mxu0 %v5973_v39 }
 0x219   : > { %4797 = vmatpush3.bf16.msra.mxu1 %v5411_v10  ;;  %v2623_v10 = vpack.c.bf16 %v2603_v63, %v2602_v1  ;;  %v2905_v63 = vld [vmem:[#allocation2 + $0x170] sm:$0xff]  ;;  %v2904_v1 = vld [vmem:[#allocation2 + $0x168] sm:$0xff] }
 0x21a   : > { %4798 = vmatprep.subr.bf16.mxu1 %v5412_v13  ;;  %4657 = vmatpush3.bf16.msra.mxu0 %v5973_v39  ;;  %v6187_v39 = vpack.c.bf16 %v2290_v59, %v2289_v38  ;;  %v2608_v38 = vld [vmem:[#allocation2 + $0x207] sm:$0xff] }
 0x21b   : > { %4627 = vmatmul.mubr.bf16.gmra.mrb[44].mxu0 %v6175_v37  ;;  %4658 = vmatprep.subr.bf16.mxu0 %v5977_v41  ;;  %v2626_v59 = vpack.c.bf16 %v2609_v14, %v2608_v38  ;;  %v2911_v14 = vld [vmem:[#allocation2 + $0x1d0] sm:$0xff]  ;;  %v5433_v38 = vld [vmem:[#allocation9 + $0x8] sm:$0xff]  }
 0x21c   : > { %4767 = vmatmul.mubr.bf16.gmra.mrb[24].mxu1 %v6165_v8  ;;  %4630 = vmatprep.mubr.bf16.mxu0 %v6177_v17 }
 0x21d   : > { %4770 = vmatprep.mubr.bf16.mxu1 %v6175_v37  ;;  %4799 = vmatpush3.bf16.msra.mxu1 %v5412_v13  ;;  %v2607_v13 = vld [vmem:[#allocation2 + $0x1ef] sm:$0xff] }
 0x21e   : > { %4800 = vmatprep.subr.bf16.mxu1 %v5413_v18  ;;  %4659 = vmatpush3.bf16.msra.mxu0 %v5977_v41  ;;  %v2293_v41 = vld [vmem:[#allocation2 + $0x169] sm:$0xff] }
 0x21f   : > { %4660 = vmatprep.subr.bf16.mxu0 %v5981_v42  ;;  %v6196_v47 = vpack.c.bf16 %v2294_v29, %v2293_v41  ;;  %v2886_v41 = vld [vmem:[#allocation2 + $0x48] sm:$0xff] }
 0x221   : > { %4801 = vmatpush3.bf16.msra.mxu1 %v5413_v18  ;;  %v2625_v18 = vpack.c.bf16 %v2607_v13, %v2606_v15  ;;  %v2909_v13 = vld [vmem:[#allocation2 + $0x1b0] sm:$0xff]  ;;  %v2908_v15 = vld [vmem:[#allocation2 + $0x1a8] sm:$0xff] }
 0x222   : > { %4802 = vmatprep.subr.bf16.mxu1 %v5414_v2  ;;  %4661 = vmatpush3.bf16.msra.mxu0 %v5981_v42  ;;  %v2297_v42 = vld [vmem:[#allocation2 + $0x1a9] sm:$0xff] }
 0x223   : > { %4631 = vmatmul.mubr.bf16.gmra.mrb[48].mxu0 %v6187_v39  ;;  %v6204_v9 = vpack.c.bf16 %v2298_v49, %v2297_v42  ;;  %v2890_v49 = vld [vmem:[#allocation2 + $0x88] sm:$0xff] }
 0x224   : > { %4771 = vmatmul.mubr.bf16.gmra.mrb[28].mxu1 %v6177_v17  ;;  %4634 = vmatprep.mubr.bf16.mxu0 %v6189_v22  ;;  %v2920_v54 = vpack.c.bf16 %v2891_v11, %v2890_v49  ;;  %v5436_v49 = vld [vmem:[#allocation9 + $0x20] sm:$0xff]  }
 0x225   : > { %4774 = vmatprep.mubr.bf16.mxu1 %v6187_v39  ;;  %4803 = vmatpush3.bf16.msra.mxu1 %v5414_v2  ;;  %v2610_v2 = vld [vmem:[#allocation2 + $0x227] sm:$0xff] }
 0x226   : > { %4804 = vmatprep.subr.bf16.mxu1 %v5415_v23  ;;  %v2627_v21 = vpack.c.bf16 %v2611_v20, %v2610_v2  ;;  %v2910_v2 = vld [vmem:[#allocation2 + $0x1c8] sm:$0xff] }
 0x227   : > { %v2930_v20 = vpack.c.bf16 %v2911_v14, %v2910_v2 }
 0x229   : > { %4805 = vmatpush3.bf16.msra.mxu1 %v5415_v23  ;;  %v2887_v23 = vld [vmem:[#allocation2 + $0x50] sm:$0xff] }
 0x22a   : > { %4838 = vmatprep.subr.bf16.mxu1 %v5416_v57  ;;  %v2918_v29 = vpack.c.bf16 %v2887_v23, %v2886_v41  ;;  %v2913_v23 = vld [vmem:[#allocation2 + $0x1f0] sm:$0xff] }
 0x22b   : > { %4635 = vmatmul.mubr.bf16.gmra.mrb[52].mxu0 %v6196_v47  ;;  %v2915_v41 = vld [vmem:[#allocation2 + $0x210] sm:$0xff] }
 0x22c   : > { %4775 = vmatmul.mubr.bf16.gmra.mrb[0].mxu1 %v6189_v22  ;;  %4638 = vmatprep.mubr.bf16.mxu0 %v6198_v48 }
 0x22d   : > { %4778 = vmatprep.mubr.bf16.mxu1 %v6196_v47 }
 0x233   : > { %4639 = vmatmul.mubr.bf16.gmra.mrb[56].mxu0 %v6204_v9 }
 0x234   : > { %4779 = vmatmul.mubr.bf16.gmra.mrb[4].mxu1 %v6198_v48  ;;  %4642 = vmatprep.mubr.bf16.mxu0 %v6206_v27 }
 0x235   : > { %4782 = vmatprep.mubr.bf16.mxu1 %v6204_v9 }
 0x23b   : > { %4643 = vmatmul.mubr.bf16.gmra.mrb[60].mxu0 %v6212_v25 }
 0x23c   : > { %4783 = vmatmul.mubr.bf16.gmra.mrb[8].mxu1 %v6206_v27  ;;  %4662 = vmatprep.mubr.bf16.mxu0 %v6096_v61  ;;  %v5418_v61 = vld [vmem:[#allocation8 + $0x1d0] sm:$0xff]  }
 0x23d   : > { %4786 = vmatprep.mubr.bf16.mxu1 %v6212_v25 }
 0x243   : > { %4663 = vmatmul.mubr.bf16.vlgmr.msra.gmra.mrb[32].mxu0 %v6098_v4 }
 0x244   : > { %4787 = vmatmul.mubr.bf16.gmra.mrb[12].mxu1 %v6218_v7  ;;  %4666 = vmatprep.mubr.bf16.mxu0 %v6105_v16 }
 0x245   : > { %4806 = vmatprep.mubr.bf16.mxu1 %v6098_v4  ;;  %v5420_v4 = vld [vmem:[#allocation8 + $0x1e0] sm:$0xff]  }
 0x24b   : > { %4667 = vmatmul.mubr.bf16.gmra.mrb[36].mxu0 %v6107_v19 }
 0x24c   : > { %4807 = vmatmul.mubr.bf16.vlgmr.msra.gmra.mrb[16].mxu1 %v6105_v16  ;;  %4670 = vmatprep.mubr.bf16.mxu0 %v6113_v26  ;;  %v5421_v16 = vld [vmem:[#allocation8 + $0x1e8] sm:$0xff]  }
 0x24d   : > { %4839 = vmatpush3.bf16.msra.mxu1 %v5416_v57  ;;  %4810 = vmatprep.mubr.bf16.mxu1 %v6107_v19  ;;  %v5422_v19 = vld [vmem:[#allocation8 + $0x1f0] sm:$0xff]  }
 0x24e   : > { %4840 = vmatprep.subr.bf16.mxu1 %v5417_v5  ;;  %v2889_v57 = vld [vmem:[#allocation2 + $0x70] sm:$0xff] }
 0x24f   : > { %v2919_v42 = vpack.c.bf16 %v2889_v57, %v2888_v44  ;;  %v5435_v57 = vld [vmem:[#allocation9 + $0x18] sm:$0xff]   ;;  %v2914_v44 = vld [vmem:[#allocation2 + $0x208] sm:$0xff] }
 0x251   : > { %4841 = vmatpush3.bf16.msra.mxu1 %v5417_v5  ;;  %v2921_v5 = vpack.c.bf16 %v2893_v60, %v2892_v53 }
 0x252   : > { %4842 = vmatprep.subr.bf16.mxu1 %v5418_v61 }
 0x253   : > { %4671 = vmatmul.mubr.bf16.gmra.mrb[40].mxu0 %v6115_v31 }
 0x254   : > { %4811 = vmatmul.mubr.bf16.gmra.mrb[20].mxu1 %v6113_v26  ;;  %4674 = vmatprep.mubr.bf16.mxu0 %v6121_v52  ;;  %v2595_v26 = vld [vmem:[#allocation2 + $0x12f] sm:$0xff] }
 0x255   : > { %4814 = vmatprep.mubr.bf16.mxu1 %v6115_v31  ;;  %4843 = vmatpush3.bf16.msra.mxu1 %v5418_v61  ;;  %v2619_v31 = vpack.c.bf16 %v2595_v26, %v2594_v33  ;;  %v2894_v61 = vld [vmem:[#allocation2 + $0xc8] sm:$0xff]  ;;  %v2899_v26 = vld [vmem:[#allocation2 + $0x110] sm:$0xff] }
 0x256   : > { %4844 = vmatprep.subr.bf16.mxu1 %v5419_v28 }
 0x259   : > { %4845 = vmatpush3.bf16.msra.mxu1 %v5419_v28  ;;  %v5427_v28 = vld [vmem:[#allocation8 + $0x218] sm:$0xff]  }
 0x25a   : > { %4846 = vmatprep.subr.bf16.mxu1 %v5420_v4 }
 0x25b   : > { %4675 = vmatmul.mubr.bf16.gmra.mrb[44].mxu0 %v6123_v55 }
 0x25c   : > { %4815 = vmatmul.mubr.bf16.gmra.mrb[24].mxu1 %v6121_v52  ;;  %v2599_v52 = vld [vmem:[#allocation2 + $0x16f] sm:$0xff] }
 0x25d   : > { %4818 = vmatprep.mubr.bf16.mxu1 %v6123_v55  ;;  %4847 = vmatpush3.bf16.msra.mxu1 %v5420_v4  ;;  %v2598_v55 = vld [vmem:[#allocation2 + $0x167] sm:$0xff]  ;;  %v2922_v4 = vpack.c.bf16 %v2895_v51, %v2894_v61 }
 0x25e   : > { %4848 = vmatprep.subr.bf16.mxu1 %v5421_v16  ;;  %v2621_v46 = vpack.c.bf16 %v2599_v52, %v2598_v55  ;;  %v2903_v52 = vld [vmem:[#allocation2 + $0x150] sm:$0xff] }
 0x261   : > { %4849 = vmatpush3.bf16.msra.mxu1 %v5421_v16  ;;  %v5428_v16 = vld [vmem:[#allocation8 + $0x220] sm:$0xff]  }
 0x262   : > { %4850 = vmatprep.subr.bf16.mxu1 %v5422_v19 }
 0x264   : > { %4819 = vmatmul.mubr.bf16.gmra.mrb[28].mxu1 %v2619_v31  ;;  %v2898_v31 = vld [vmem:[#allocation2 + $0x108] sm:$0xff] }
 0x265   : > { %4822 = vmatprep.mubr.bf16.mxu1 %v2620_v62  ;;  %4851 = vmatpush3.bf16.msra.mxu1 %v5422_v19  ;;  %v2897_v19 = vld [vmem:[#allocation2 + $0xf0] sm:$0xff] }
 0x266   : > { %4852 = vmatprep.subr.bf16.mxu1 %v5423_v3  ;;  %v2923_v33 = vpack.c.bf16 %v2897_v19, %v2896_v30  ;;  %v5430_v62 = vld [vmem:[#allocation8 + $0x230] sm:$0xff]  }
 0x269   : > { %4853 = vmatpush3.bf16.msra.mxu1 %v5423_v3  ;;  %v2924_v3 = vpack.c.bf16 %v2899_v26, %v2898_v31 }
 0x26a   : > { %4886 = vmatprep.subr.bf16.mxu1 %v5424_v6 }
 0x26c   : > { %4823 = vmatmul.mubr.bf16.gmra.mrb[0].mxu1 %v2621_v46  ;;  %v2902_v46 = vld [vmem:[#allocation2 + $0x148] sm:$0xff] }
 0x26d   : > { %4826 = vmatprep.mubr.bf16.mxu1 %v2622_v32  ;;  %v2926_v32 = vpack.c.bf16 %v2903_v52, %v2902_v46  ;;  %v5439_v52 = vld [vmem:[#allocation9 + $0x38] sm:$0xff]  }
 0x274   : > { %4827 = vmatmul.mubr.bf16.gmra.mrb[4].mxu1 %v2623_v10  ;;  %v2927_v10 = vpack.c.bf16 %v2905_v63, %v2904_v1  ;;  %v6293_v63 = vld [vmem:[%s6490_s4] ss:$0 sm:$0xff] }
 0x275   : > { %4830 = vmatprep.mubr.bf16.mxu1 %v2624_v12  ;;  %v2928_v12 = vpack.c.bf16 %v2907_v35, %v2906_v36 }
 0x27c   : > { %4831 = vmatmul.mubr.bf16.gmra.mrb[8].mxu1 %v2625_v18  ;;  %v5432_v18 = vld [vmem:[#allocation9] sm:$0xff]  }
 0x27d   : > { %4834 = vmatprep.mubr.bf16.mxu1 %v2626_v59  ;;  %v2929_v59 = vpack.c.bf16 %v2909_v13, %v2908_v15  ;;  %4934 = vmatprep.subr.bf16.mxu0 %v5432_v18 }
 0x27e   : > { %4935 = vmatpush3.bf16.msra.mxu0 %v5432_v18 }
 0x27f   : > { %4936 = vmatprep.subr.bf16.mxu0 %v5433_v38 }
 0x282   : > { %4937 = vmatpush3.bf16.msra.mxu0 %v5433_v38 }
 0x284   : > { %4835 = vmatmul.mubr.bf16.gmra.mrb[12].mxu1 %v2627_v21  ;;  %v5434_v21 = vld [vmem:[#allocation9 + $0x10] sm:$0xff]  }
 0x285   : > { %4854 = vmatprep.mubr.bf16.mxu1 %v2918_v29  ;;  %v2912_v29 = vld [vmem:[#allocation2 + $0x1e8] sm:$0xff]  ;;  %4938 = vmatprep.subr.bf16.mxu0 %v5434_v21 }
 0x286   : > { %v2931_v11 = vpack.c.bf16 %v2913_v23, %v2912_v29  ;;  %4939 = vmatpush3.bf16.msra.mxu0 %v5434_v21 }
 0x287   : > { %4940 = vmatprep.subr.bf16.mxu0 %v5435_v57 }
 0x28a   : > { %4941 = vmatpush3.bf16.msra.mxu0 %v5435_v57 }
 0x28b   : > { %4942 = vmatprep.subr.bf16.mxu0 %v5436_v49 }
 0x28c   : > { %4855 = vmatmul.mubr.bf16.vlgmr.msra.gmra.mrb[16].mxu1 %v2919_v42  ;;  %v2932_v42 = vpack.c.bf16 %v2915_v41, %v2914_v44 }
 0x28d   : > { %4887 = vmatpush3.bf16.msra.mxu1 %v5424_v6  ;;  %4858 = vmatprep.mubr.bf16.mxu1 %v2920_v54  ;;  %v2901_v6 = vld [vmem:[#allocation2 + $0x130] sm:$0xff] }
 0x28e   : > { %4888 = vmatprep.subr.bf16.mxu1 %v5425_v50  ;;  %v2925_v55 = vpack.c.bf16 %v2901_v6, %v2900_v40  ;;  %4943 = vmatpush3.bf16.msra.mxu0 %v5436_v49 }
 0x291   : > { %4889 = vmatpush3.bf16.msra.mxu1 %v5425_v50  ;;  %v5456_v50 = vld [vmem:[#allocation2 + $0x8] sm:$0xff] }
 0x292   : > { %4890 = vmatprep.subr.bf16.mxu1 %v5426_v56  ;;  %v2933_v54 = vpack.c.bf16 %v5456_v50, %v5456_v50 }
 0x294   : > { %4859 = vmatmul.mubr.bf16.gmra.mrb[20].mxu1 %v2921_v5 }
 0x295   : > { %4862 = vmatprep.mubr.bf16.mxu1 %v2922_v4  ;;  %4891 = vmatpush3.bf16.msra.mxu1 %v5426_v56 }
 0x296   : > { %4892 = vmatprep.subr.bf16.mxu1 %v5427_v28 }
 0x299   : > { %4893 = vmatpush3.bf16.msra.mxu1 %v5427_v28 }
 0x29a   : > { %4894 = vmatprep.subr.bf16.mxu1 %v5428_v16 }
 0x29c   : > { %4863 = vmatmul.mubr.bf16.gmra.mrb[24].mxu1 %v2923_v33  ;;  %v5437_v33 = vld [vmem:[#allocation9 + $0x28] sm:$0xff]  }
 0x29d   : > { %4866 = vmatprep.mubr.bf16.mxu1 %v2924_v3  ;;  %4895 = vmatpush3.bf16.msra.mxu1 %v5428_v16  ;;  %v5438_v3 = vld [vmem:[#allocation9 + $0x30] sm:$0xff]  }
 0x29e   : > { %4896 = vmatprep.subr.bf16.mxu1 %v5429_v0  ;;  %4944 = vmatprep.subr.bf16.mxu0 %v5437_v33 }
 0x29f   : > { %4945 = vmatpush3.bf16.msra.mxu0 %v5437_v33 }
 0x2a0   : > { %4946 = vmatprep.subr.bf16.mxu0 %v5438_v3 }
 0x2a1   : > { %4897 = vmatpush3.bf16.msra.mxu1 %v5429_v0 }
 0x2a2   : > { %4898 = vmatprep.subr.bf16.mxu1 %v5430_v62 }
 0x2a3   : > { %4947 = vmatpush3.bf16.msra.mxu0 %v5438_v3 }
 0x2a4   : > { %4867 = vmatmul.mubr.bf16.gmra.mrb[28].mxu1 %v2925_v55  ;;  %4948 = vmatprep.subr.bf16.mxu0 %v5439_v52 }
 0x2a5   : > { %4870 = vmatprep.mubr.bf16.mxu1 %v2926_v32  ;;  %4899 = vmatpush3.bf16.msra.mxu1 %v5430_v62 }
 0x2a6   : > { %4900 = vmatprep.subr.bf16.mxu1 %v5431_v34 }
 0x2a7   : > { %4949 = vmatpush3.bf16.msra.mxu0 %v5439_v52 }
 0x2a9   : > { %4901 = vmatpush3.bf16.msra.mxu1 %v5431_v34 }
 0x2ac   : > { %4871 = vmatmul.mubr.bf16.gmra.mrb[0].mxu1 %v2927_v10 }
 0x2ad   : > { %4874 = vmatprep.mubr.bf16.mxu1 %v2928_v12 }
 0x2b4   : > { %4875 = vmatmul.mubr.bf16.gmra.mrb[4].mxu1 %v2929_v59 }
 0x2b5   : > { %4878 = vmatprep.mubr.bf16.mxu1 %v2930_v20 }
 0x2bc   : > { %4879 = vmatmul.mubr.bf16.gmra.mrb[8].mxu1 %v2931_v11 }
 0x2bd   : > { %4882 = vmatprep.mubr.bf16.mxu1 %v2932_v42 }
 0x2c4   : > { %4883 = vmatmul.mubr.bf16.gmra.mrb[12].mxu1 %v2933_v54 }
 0x2c5   : > { %4902 = vmatprep.mubr.bf16.mxu1 %v6145_v24 }
 0x2cc   : > { %4903 = vmatmul.mubr.bf16.vlgmr.msra.gmra.mrb[16].mxu1 %v6151_v45 }
 0x2cd   : > { %4906 = vmatprep.mubr.bf16.mxu1 %v6154_v58 }
 0x2d4   : > { %4907 = vmatmul.mubr.bf16.gmra.mrb[20].mxu1 %v6163_v43 }
 0x2d5   : > { %4910 = vmatprep.mubr.bf16.mxu1 %v6165_v8  ;;  %v3222_v8 = vld [vmem:[#allocation2 + $0x229] sm:$0xff] }
 0x2dc   : > { %4911 = vmatmul.mubr.bf16.gmra.mrb[24].mxu1 %v6175_v37  ;;  %v3223_v37 = vld [vmem:[#allocation2 + $0x231] sm:$0xff] }
 0x2dd   : > { %4914 = vmatprep.mubr.bf16.mxu1 %v6177_v17 }
 0x2e4   : > { %4915 = vmatmul.mubr.bf16.gmra.mrb[28].mxu1 %v6187_v39 }
 0x2e5   : > { %4918 = vmatprep.mubr.bf16.mxu1 %v6189_v22  ;;  %v3239_v22 = vpack.c.bf16 %v3223_v37, %v3222_v8 }
 0x2ec   : > { %4919 = vmatmul.mubr.bf16.gmra.mrb[0].mxu1 %v6196_v47 }
 0x2ed   : > { %4922 = vmatprep.mubr.bf16.mxu1 %v6198_v48 }
 0x2f4   : > { %4923 = vmatmul.mubr.bf16.gmra.mrb[4].mxu1 %v6204_v9 }
 0x2f5   : > { %4926 = vmatprep.mubr.bf16.mxu1 %v6206_v27 }
 0x2f6   : > { %v6248_v24 = vpop.f32.mrb[48].mxu0 }
 0x2f7   : > { %v6250_v45 = vpop.f32.mrb[49].mxu0 }
 0x2f8   : > { %v6252_v58 = vpop.f32.mrb[50].mxu0 }
 0x2f9   : > { %v6254_v43 = vpop.f32.mrb[51].mxu0 }
 0x2fc   : > { %4927 = vmatmul.mubr.bf16.gmra.mrb[8].mxu1 %v6212_v25 }
 0x2fd   : > { %4930 = vmatprep.mubr.bf16.mxu1 %v6218_v7 }
 0x2fe   : > { %v6258_v17 = vpop.f32.mrb[52].mxu0 }
 0x2ff   : > { %v6260_v39 = vpop.f32.mrb[53].mxu0 }
 0x300   : > { %v6262_v47 = vpop.f32.mrb[54].mxu0 }
 0x301   : > { %v6264_v48 = vpop.f32.mrb[55].mxu0 }
 0x304   : > { %4931 = vmatmul.mubr.bf16.gmra.mrb[12].mxu1 %v3239_v22 }
 0x306   : > { %v6266_v9 = vpop.f32.mrb[56].mxu0 }
 0x307   : > { %v6268_v27 = vpop.f32.mrb[57].mxu0 }
 0x308   : > { %v6270_v56 = vpop.f32.mrb[58].mxu0 }
 0x309   : > { %v6272_v25 = vpop.f32.mrb[59].mxu0 }
 0x30e   : > { %v6274_v7 = vpop.f32.mrb[60].mxu0 }
 0x30f   : > { %v6276_v60 = vpop.f32.mrb[61].mxu0 }
 0x310   : > { %v6278_v51 = vpop.f32.mrb[62].mxu0 }
 0x311   : > { %v6280_v53 = vpop.f32.mrb[63].mxu0 }
 0x316   : > { %v4664_v5 = vpop.f32.mrb[32].mxu0 }
 0x317   : > { %v1808_v61 = vpop.f32.mrb[33].mxu0 }
 0x318   : > { %v4665_v28 = vpop.f32.mrb[34].mxu0 }
 0x319   : > { %v1811_v4 = vpop.f32.mrb[35].mxu0 }
 0x31e   : > { %v4668_v16 = vpop.f32.mrb[36].mxu0 }
 0x31f   : > { %v1824_v19 = vpop.f32.mrb[37].mxu0 }
 0x320   : > { %v4669_v26 = vpop.f32.mrb[38].mxu0 }
 0x321   : > { %v1827_v30 = vpop.f32.mrb[39].mxu0 }
 0x326   : > { %v4672_v31 = vpop.f32.mrb[40].mxu0 }
 0x327   : > { %v1840_v0 = vpop.f32.mrb[41].mxu0 }
 0x328   : > { %v4673_v62 = vpop.f32.mrb[42].mxu0 }
 0x329   : > { %v1843_v6 = vpop.f32.mrb[43].mxu0 }
 0x32e   : > { %v6282_v40 = vpop.f32.mrb[44].mxu0 }
 0x32f   : > { %v6284_v55 = vpop.f32.mrb[45].mxu0 }
 0x330   : > { %v6286_v46 = vpop.f32.mrb[46].mxu0 }
 0x331   : > { %v6288_v34 = vpop.f32.mrb[47].mxu0 }
 0x39f   : > { %v4904_v32 = vpop.f32.mrb[16].mxu1 }
 0x3a0   : > { %v4998_v35 = vadd.f32 %v4904_v32, %v4664_v5  ;;  %v3339_v1 = vpop.f32.mrb[17].mxu1 }
 0x3a1   : > { %v4999_v10 = vadd.f32 %v3339_v1, %v1808_v61  ;;  %v4905_v36 = vpop.f32.mrb[18].mxu1 }
 0x3a2   : > { %v3507_v12 = vadd.f32 %v4998_v35, %v6293_v63  ;;  %v5000_v13 = vadd.f32 %v4905_v36, %v4665_v28  ;;  %v3342_v14 = vpop.f32.mrb[19].mxu1 }
 0x3a3   : > { %v3505_v15 = vadd.f32 %v4999_v10, %v6293_v63  ;;  %v5001_v18 = vadd.f32 %v3342_v14, %v1811_v4 }
 0x3a4   : > { %v3508_v38 = vadd.f32 %v5000_v13, %v6293_v63  ;;  %v3539_v2 = vmax.f32 %v3507_v12, 0.0 }
 0x3a5   : > { %v3506_v59 = vadd.f32 %v5001_v18, %v6293_v63  ;;  %v3537_v21 = vmax.f32 %v3505_v15, 0.0 }
 0x3a6   : > { %v3540_v20 = vmax.f32 %v3508_v38, 0.0 }
 0x3a7   : > { %v3538_v23 = vmax.f32 %v3506_v59, 0.0  ;;  %v4908_v41 = vpop.f32.mrb[20].mxu1 }
 0x3a8   : > { %v3570_v29 = vpack.c.bf16 %v3540_v20, %v3539_v2  ;;  %v5002_v57 = vadd.f32 %v4908_v41, %v4668_v16  ;;  %v3355_v11 = vpop.f32.mrb[21].mxu1 }
 0x3a9   : > { %v5003_v44 = vadd.f32 %v3355_v11, %v1824_v19  ;;  %v4909_v42 = vpop.f32.mrb[22].mxu1  ;;  %v3569_v49 = vpack.c.bf16 %v3538_v23, %v3537_v21 }
 0x3aa   : > { %v3511_v50 = vadd.f32 %v5002_v57, %v6293_v63  ;;  %v5004_v54 = vadd.f32 %v4909_v42, %v4669_v26  ;;  %v3358_v8 = vpop.f32.mrb[23].mxu1 }
 0x3ab   : > { %v3509_v37 = vadd.f32 %v5003_v44, %v6293_v63  ;;  %v5005_v22 = vadd.f32 %v3358_v8, %v1827_v30  ;;  %4950 = vmatprep.mubr.bf16.mxu0 %v3569_v49 }
 0x3ac   : > { %v3512_v5 = vadd.f32 %v5004_v54, %v6293_v63  ;;  %4951 = vmatmul.mubr.bf16.vlgmr.msra.gmra.mrb[64].mxu0 %v3570_v29  ;;  %v3543_v28 = vmax.f32 %v3511_v50, 0.0 }
 0x3ad   : > { %v3510_v61 = vadd.f32 %v5005_v22, %v6293_v63  ;;  %v3541_v16 = vmax.f32 %v3509_v37, 0.0 }
 0x3ae   : > { %v3544_v4 = vmax.f32 %v3512_v5, 0.0 }
 0x3af   : > { %v3542_v33 = vmax.f32 %v3510_v61, 0.0  ;;  %v4912_v19 = vpop.f32.mrb[24].mxu1 }
 0x3b0   : > { %v5006_v3 = vadd.f32 %v4912_v19, %v4672_v31  ;;  %v3371_v52 = vpop.f32.mrb[25].mxu1  ;;  %v3572_v32 = vpack.c.bf16 %v3544_v4, %v3543_v28 }
 0x3b1   : > { %v5007_v35 = vadd.f32 %v3371_v52, %v1840_v0  ;;  %v4913_v26 = vpop.f32.mrb[26].mxu1  ;;  %v3571_v1 = vpack.c.bf16 %v3542_v33, %v3541_v16 }
 0x3b2   : > { %v3515_v10 = vadd.f32 %v5006_v3, %v6293_v63  ;;  %v5008_v30 = vadd.f32 %v4913_v26, %v4673_v62  ;;  %v3374_v36 = vpop.f32.mrb[27].mxu1 }
 0x3b3   : > { %v3513_v12 = vadd.f32 %v5007_v35, %v6293_v63  ;;  %v5009_v13 = vadd.f32 %v3374_v36, %v1843_v6  ;;  %4954 = vmatprep.mubr.bf16.mxu0 %v3571_v1 }
 0x3b4   : > { %v3516_v14 = vadd.f32 %v5008_v30, %v6293_v63  ;;  %4955 = vmatmul.mubr.bf16.gmra.mrb[68].mxu0 %v3572_v32  ;;  %v3547_v18 = vmax.f32 %v3515_v10, 0.0 }
 0x3b5   : > { %v3514_v15 = vadd.f32 %v5009_v13, %v6293_v63  ;;  %v3545_v38 = vmax.f32 %v3513_v12, 0.0 }
 0x3b6   : > { %v3548_v31 = vmax.f32 %v3516_v14, 0.0 }
 0x3b7   : > { %v3546_v59 = vmax.f32 %v3514_v15, 0.0  ;;  %v4916_v0 = vpop.f32.mrb[28].mxu1 }
 0x3b8   : > { %v5010_v2 = vadd.f32 %v4916_v0, %v6282_v40  ;;  %v3387_v20 = vpop.f32.mrb[29].mxu1  ;;  %v3574_v21 = vpack.c.bf16 %v3548_v31, %v3547_v18 }
 0x3b9   : > { %v5011_v62 = vadd.f32 %v3387_v20, %v6284_v55  ;;  %v4917_v23 = vpop.f32.mrb[30].mxu1  ;;  %v3573_v41 = vpack.c.bf16 %v3546_v59, %v3545_v38 }
 0x3ba   : > { %v3519_v6 = vadd.f32 %v5010_v2, %v6293_v63  ;;  %v5012_v29 = vadd.f32 %v4917_v23, %v6286_v46  ;;  %v3390_v57 = vpop.f32.mrb[31].mxu1 }
 0x3bb   : > { %v3517_v11 = vadd.f32 %v5011_v62, %v6293_v63  ;;  %v5013_v44 = vadd.f32 %v3390_v57, %v6288_v34  ;;  %4958 = vmatprep.mubr.bf16.mxu0 %v3573_v41 }
 0x3bc   : > { %v3520_v42 = vadd.f32 %v5012_v29, %v6293_v63  ;;  %4959 = vmatmul.mubr.bf16.gmra.mrb[72].mxu0 %v3574_v21  ;;  %v3551_v49 = vmax.f32 %v3519_v6, 0.0 }
 0x3bd   : > { %v3518_v40 = vadd.f32 %v5013_v44, %v6293_v63  ;;  %v3549_v55 = vmax.f32 %v3517_v11, 0.0 }
 0x3be   : > { %v3552_v50 = vmax.f32 %v3520_v42, 0.0 }
 0x3bf   : > { %v3550_v54 = vmax.f32 %v3518_v40, 0.0  ;;  %v4920_v8 = vpop.f32.mrb[0].mxu1 }
 0x3c0   : > { %v5014_v37 = vadd.f32 %v4920_v8, %v6248_v24  ;;  %v3403_v22 = vpop.f32.mrb[1].mxu1  ;;  %v3576_v46 = vpack.c.bf16 %v3552_v50, %v3551_v49 }
 0x3c1   : > { %v5015_v5 = vadd.f32 %v3403_v22, %v6250_v45  ;;  %v4921_v61 = vpop.f32.mrb[2].mxu1  ;;  %v3575_v28 = vpack.c.bf16 %v3550_v54, %v3549_v55 }
 0x3c2   : > { %v3523_v34 = vadd.f32 %v5014_v37, %v6293_v63  ;;  %v5016_v4 = vadd.f32 %v4921_v61, %v6252_v58  ;;  %v3406_v16 = vpop.f32.mrb[3].mxu1 }
 0x3c3   : > { %v3521_v33 = vadd.f32 %v5015_v5, %v6293_v63  ;;  %v5017_v19 = vadd.f32 %v3406_v16, %v6254_v43  ;;  %4962 = vmatprep.mubr.bf16.mxu0 %v3575_v28 }
 0x3c4   : > { %v3524_v3 = vadd.f32 %v5016_v4, %v6293_v63  ;;  %4963 = vmatmul.mubr.bf16.gmra.mrb[76].mxu0 %v3576_v46  ;;  %v3555_v52 = vmax.f32 %v3523_v34, 0.0 }
 0x3c5   : > { %v3522_v24 = vadd.f32 %v5017_v19, %v6293_v63  ;;  %v3553_v45 = vmax.f32 %v3521_v33, 0.0 }
 0x3c6   : > { %v3556_v32 = vmax.f32 %v3524_v3, 0.0  ;;  %v5457_v3 = vld [vmem:[%s5923_s20 + $0x8] sm:$0xff]  }
 0x3c7   : > { %v3554_v35 = vmax.f32 %v3522_v24, 0.0  ;;  %v4924_v26 = vpop.f32.mrb[4].mxu1  ;;  %v3819_v24 = vunpack.c.l.bf16 %v5457_v3 }
 0x3c8   : > { %v5018_v1 = vadd.f32 %v4924_v26, %v6258_v17  ;;  %v3419_v10 = vpop.f32.mrb[5].mxu1  ;;  %v3578_v58 = vpack.c.bf16 %v3556_v32, %v3555_v52  ;;  %v5458_v52 = vld [vmem:[%s5923_s20] sm:$0xff]   ;;  %v3820_v26 = vunpack.c.h.bf16 %v5457_v3 }
 0x3c9   : > { %v5019_v30 = vadd.f32 %v3419_v10, %v6260_v39  ;;  %v4925_v36 = vpop.f32.mrb[6].mxu1  ;;  %v3577_v12 = vpack.c.bf16 %v3554_v35, %v3553_v45  ;;  %v3817_v32 = vunpack.c.l.bf16 %v5458_v52 }
 0x3ca   : > { %v3527_v43 = vadd.f32 %v5018_v1, %v6293_v63  ;;  %v5020_v13 = vadd.f32 %v4925_v36, %v6262_v47  ;;  %v3422_v14 = vpop.f32.mrb[7].mxu1  ;;  %v3818_v1 = vunpack.c.h.bf16 %v5458_v52  ;;  %v5463_v52 = vld [vmem:[%s5923_s20 + $0x38] sm:$0xff]  }
 0x3cb   : > { %v3525_v15 = vadd.f32 %v5019_v30, %v6293_v63  ;;  %v5021_v18 = vadd.f32 %v3422_v14, %v6264_v48  ;;  %4966 = vmatprep.mubr.bf16.mxu0 %v3577_v12 }
 0x3cc   : > { %v3528_v31 = vadd.f32 %v5020_v13, %v6293_v63  ;;  %4967 = vmatmul.mubr.bf16.gmra.mrb[80].mxu0 %v3578_v58  ;;  %v3559_v38 = vmax.f32 %v3527_v43, 0.0 }
 0x3cd   : > { %v3526_v17 = vadd.f32 %v5021_v18, %v6293_v63  ;;  %v3557_v39 = vmax.f32 %v3525_v15, 0.0 }
 0x3ce   : > { %v3560_v59 = vmax.f32 %v3528_v31, 0.0 }
 0x3cf   : > { %v3558_v0 = vmax.f32 %v3526_v17, 0.0  ;;  %v4928_v2 = vpop.f32.mrb[8].mxu1 }
 0x3d0   : > { %v5022_v20 = vadd.f32 %v4928_v2, %v6266_v9  ;;  %v3435_v21 = vpop.f32.mrb[9].mxu1  ;;  %v3580_v47 = vpack.c.bf16 %v3560_v59, %v3559_v38  ;;  %v5459_v38 = vld [vmem:[%s5923_s20 + $0x18] sm:$0xff]   ;;  %v5460_v2 = vld [vmem:[%s5923_s20 + $0x10] sm:$0xff]  }
 0x3d1   : > { %v5023_v62 = vadd.f32 %v3435_v21, %v6268_v27  ;;  %v4929_v23 = vpop.f32.mrb[10].mxu1  ;;  %v3579_v41 = vpack.c.bf16 %v3558_v0, %v3557_v39  ;;  %v3823_v59 = vunpack.c.l.bf16 %v5459_v38 }
 0x3d2   : > { %v3531_v48 = vadd.f32 %v5022_v20, %v6293_v63  ;;  %v5024_v6 = vadd.f32 %v4929_v23, %v6270_v56  ;;  %v3438_v29 = vpop.f32.mrb[11].mxu1  ;;  %v3821_v20 = vunpack.c.l.bf16 %v5460_v2 }
 0x3d3   : > { %v3529_v57 = vadd.f32 %v5023_v62, %v6293_v63  ;;  %v5025_v11 = vadd.f32 %v3438_v29, %v6272_v25  ;;  %4970 = vmatprep.mubr.bf16.mxu0 %v3579_v41  ;;  %v3824_v62 = vunpack.c.h.bf16 %v5459_v38 }
 0x3d4   : > { %v3532_v44 = vadd.f32 %v5024_v6, %v6293_v63  ;;  %4971 = vmatmul.mubr.bf16.gmra.mrb[84].mxu0 %v3580_v47  ;;  %v3563_v42 = vmax.f32 %v3531_v48, 0.0  ;;  %v3822_v48 = vunpack.c.h.bf16 %v5460_v2 }
 0x3d5   : > { %v3530_v9 = vadd.f32 %v5025_v11, %v6293_v63  ;;  %v3561_v27 = vmax.f32 %v3529_v57, 0.0 }
 0x3d6   : > { %v3564_v40 = vmax.f32 %v3532_v44, 0.0 }
 0x3d7   : > { %v3562_v49 = vmax.f32 %v3530_v9, 0.0  ;;  %v4932_v50 = vpop.f32.mrb[12].mxu1 }
 0x3d8   : > { %v5026_v55 = vadd.f32 %v4932_v50, %v6274_v7  ;;  %v3451_v54 = vpop.f32.mrb[13].mxu1  ;;  %v3582_v56 = vpack.c.bf16 %v3564_v40, %v3563_v42  ;;  %v5461_v50 = vld [vmem:[%s5923_s20 + $0x28] sm:$0xff]  }
 0x3d9   : > { %v5027_v8 = vadd.f32 %v3451_v54, %v6276_v60  ;;  %v4933_v37 = vpop.f32.mrb[14].mxu1  ;;  %v3581_v22 = vpack.c.bf16 %v3562_v49, %v3561_v27 }
 0x3da   : > { %v3535_v25 = vadd.f32 %v5026_v55, %v6293_v63  ;;  %v5028_v46 = vadd.f32 %v4933_v37, %v6278_v51  ;;  %v3454_v5 = vpop.f32.mrb[15].mxu1  ;;  %v3827_v55 = vunpack.c.l.bf16 %v5461_v50 }
 0x3db   : > { %v3533_v61 = vadd.f32 %v5027_v8, %v6293_v63  ;;  %v5029_v28 = vadd.f32 %v3454_v5, %v6280_v53  ;;  %4974 = vmatprep.mubr.bf16.mxu0 %v3581_v22  ;;  %v6350_v53 = vld [vmem:[%s6492_s6] ss:$0 sm:$0xff] }
 0x3dc   : > { %v3536_v7 = vadd.f32 %v5028_v46, %v6293_v63  ;;  %4975 = vmatmul.mubr.bf16.gmra.mrb[88].mxu0 %v3582_v56  ;;  %v3567_v34 = vmax.f32 %v3535_v25, 0.0  ;;  %v5462_v8 = vld [vmem:[%s5923_s20 + $0x20] sm:$0xff]   ;;  %v3828_v46 = vunpack.c.h.bf16 %v5461_v50 }
 0x3dd   : > { %v3534_v60 = vadd.f32 %v5029_v28, %v6293_v63  ;;  %v3565_v16 = vmax.f32 %v3533_v61, 0.0  ;;  %v3825_v37 = vunpack.c.l.bf16 %v5462_v8  ;;  %v3826_v28 = vunpack.c.h.bf16 %v5462_v8 }
 0x3de   : > { %v3568_v4 = vmax.f32 %v3536_v7, 0.0 }
 0x3df   : > { %v3566_v33 = vmax.f32 %v3534_v60, 0.0 }
 0x3e0   : > { %v3584_v19 = vpack.c.bf16 %v3568_v4, %v3567_v34 }
 0x3e1   : > { %v3583_v51 = vpack.c.bf16 %v3566_v33, %v3565_v16 }
 0x3e3   : > { %4978 = vmatprep.mubr.bf16.mxu0 %v3583_v51 }
 0x3e4   : > { %4979 = vmatmul.mubr.bf16.gmra.mrb[92].mxu0 %v3584_v19 }
 0x47f   : > { %v4952_v45 = vpop.f32.mrb[64].mxu0 }
 0x480   : > { %v3699_v63 = vadd.f32 %v4952_v45, %v6350_v53  ;;  %v3690_v35 = vpop.f32.mrb[65].mxu0 }
 0x481   : > { %v3691_v10 = vadd.f32 %v6350_v53, %v3690_v35  ;;  %v4953_v58 = vpop.f32.mrb[66].mxu0  ;;  %v5464_v35 = vld [vmem:[%s5923_s20 + $0x30] sm:$0xff]  }
 0x482   : > { %v3851_v30 = vadd.f32 %v3819_v24, %v3699_v63  ;;  %v3702_v36 = vadd.f32 %v4953_v58, %v6350_v53  ;;  %v3693_v12 = vpop.f32.mrb[67].mxu0  ;;  %v3832_v58 = vunpack.c.h.bf16 %v5463_v52 }
 0x483   : > { %v3849_v43 = vadd.f32 %v3817_v32, %v3691_v10  ;;  %v3694_v13 = vadd.f32 %v6350_v53, %v3693_v12  ;;  %v3831_v32 = vunpack.c.l.bf16 %v5463_v52  ;;  %v3830_v12 = vunpack.c.h.bf16 %v5464_v35 }
 0x484   : > { %v3883_v14 = vmax.f32 %v3851_v30, 0.0  ;;  %v3852_v15 = vadd.f32 %v3820_v26, %v3702_v36  ;;  %v3829_v26 = vunpack.c.l.bf16 %v5464_v35 }
 0x485   : > { %v3881_v18 = vmax.f32 %v3849_v43, 0.0  ;;  %v3850_v31 = vadd.f32 %v3818_v1, %v3694_v13 }
 0x486   : > { %3915 = vst [vmem:[%s6359_s12 + $0x10] sm:$0xff] %v3883_v14  ;;  %v3884_v17 = vmax.f32 %v3852_v15, 0.0 }
 0x487   : > { %3913 = vst [vmem:[%s6359_s12] sm:$0xff] %v3881_v18  ;;  %v3882_v39 = vmax.f32 %v3850_v31, 0.0  ;;  %v4956_v0 = vpop.f32.mrb[68].mxu0 }
 0x488   : > { %3916 = vst [vmem:[%s6359_s12 + $0x18] sm:$0xff] %v3884_v17  ;;  %v3715_v21 = vadd.f32 %v4956_v0, %v6350_v53  ;;  %v3706_v47 = vpop.f32.mrb[69].mxu0  ;;  %v5465_v0 = vld [vmem:[%s5923_s20 + $0x48] sm:$0xff]  }
 0x489   : > { %3914 = vst [vmem:[%s6359_s12 + $0x8] sm:$0xff] %v3882_v39  ;;  %v3707_v23 = vadd.f32 %v6350_v53, %v3706_v47  ;;  %v4957_v41 = vpop.f32.mrb[70].mxu0  ;;  %v3835_v2 = vunpack.c.l.bf16 %v5465_v0  ;;  %v5466_v47 = vld [vmem:[%s5923_s20 + $0x40] sm:$0xff]  }
 0x48a   : > { %v3855_v6 = vadd.f32 %v3823_v59, %v3715_v21  ;;  %v3718_v29 = vadd.f32 %v4957_v41, %v6350_v53  ;;  %v3709_v57 = vpop.f32.mrb[71].mxu0 }
 0x48b   : > { %v3853_v11 = vadd.f32 %v3821_v20, %v3707_v23  ;;  %v3710_v44 = vadd.f32 %v6350_v53, %v3709_v57  ;;  %v3834_v57 = vunpack.c.h.bf16 %v5466_v47 }
 0x48c   : > { %v3887_v9 = vmax.f32 %v3855_v6, 0.0  ;;  %v3856_v42 = vadd.f32 %v3824_v62, %v3718_v29  ;;  %v3833_v62 = vunpack.c.l.bf16 %v5466_v47 }
 0x48d   : > { %v3885_v40 = vmax.f32 %v3853_v11, 0.0  ;;  %v3854_v27 = vadd.f32 %v3822_v48, %v3710_v44  ;;  %v3836_v48 = vunpack.c.h.bf16 %v5465_v0 }
 0x48e   : > { %3919 = vst [vmem:[%s6359_s12 + $0x30] sm:$0xff] %v3887_v9  ;;  %v3888_v49 = vmax.f32 %v3856_v42, 0.0 }
 0x48f   : > { %3917 = vst [vmem:[%s6359_s12 + $0x20] sm:$0xff] %v3885_v40  ;;  %v3886_v54 = vmax.f32 %v3854_v27, 0.0  ;;  %v4960_v56 = vpop.f32.mrb[72].mxu0 }
 0x490   : > { %3920 = vst [vmem:[%s6359_s12 + $0x38] sm:$0xff] %v3888_v49  ;;  %v3731_v22 = vadd.f32 %v4960_v56, %v6350_v53  ;;  %v3722_v25 = vpop.f32.mrb[73].mxu0  ;;  %v5467_v56 = vld [vmem:[%s5923_s20 + $0x58] sm:$0xff]  }
 0x491   : > { %3918 = vst [vmem:[%s6359_s12 + $0x28] sm:$0xff] %v3886_v54  ;;  %v3723_v5 = vadd.f32 %v6350_v53, %v3722_v25  ;;  %v4961_v61 = vpop.f32.mrb[74].mxu0  ;;  %v3839_v8 = vunpack.c.l.bf16 %v5467_v56  ;;  %v5468_v25 = vld [vmem:[%s5923_s20 + $0x50] sm:$0xff]  }
 0x492   : > { %v3859_v7 = vadd.f32 %v3827_v55, %v3731_v22  ;;  %v3734_v60 = vadd.f32 %v4961_v61, %v6350_v53  ;;  %v3725_v34 = vpop.f32.mrb[75].mxu0 }
 0x493   : > { %v3857_v4 = vadd.f32 %v3825_v37, %v3723_v5  ;;  %v3726_v16 = vadd.f32 %v6350_v53, %v3725_v34  ;;  %v3838_v34 = vunpack.c.h.bf16 %v5468_v25 }
 0x494   : > { %v3891_v33 = vmax.f32 %v3859_v7, 0.0  ;;  %v3860_v19 = vadd.f32 %v3828_v46, %v3734_v60  ;;  %v3837_v46 = vunpack.c.l.bf16 %v5468_v25 }
 0x495   : > { %v3889_v51 = vmax.f32 %v3857_v4, 0.0  ;;  %v3858_v3 = vadd.f32 %v3826_v28, %v3726_v16  ;;  %v3840_v28 = vunpack.c.h.bf16 %v5467_v56 }
 0x496   : > { %3923 = vst [vmem:[%s6359_s12 + $0x50] sm:$0xff] %v3891_v33  ;;  %v3892_v24 = vmax.f32 %v3860_v19, 0.0 }
 0x497   : > { %3921 = vst [vmem:[%s6359_s12 + $0x40] sm:$0xff] %v3889_v51  ;;  %v3890_v45 = vmax.f32 %v3858_v3, 0.0  ;;  %v4964_v63 = vpop.f32.mrb[76].mxu0 }
 0x498   : > { %3924 = vst [vmem:[%s6359_s12 + $0x58] sm:$0xff] %v3892_v24  ;;  %v3747_v1 = vadd.f32 %v4964_v63, %v6350_v53  ;;  %v3738_v10 = vpop.f32.mrb[77].mxu0  ;;  %v5469_v63 = vld [vmem:[%s5923_s20 + $0x68] sm:$0xff]  }
 0x499   : > { %3922 = vst [vmem:[%s6359_s12 + $0x48] sm:$0xff] %v3890_v45  ;;  %v3739_v30 = vadd.f32 %v6350_v53, %v3738_v10  ;;  %v4965_v36 = vpop.f32.mrb[78].mxu0  ;;  %v3843_v35 = vunpack.c.l.bf16 %v5469_v63  ;;  %v5470_v10 = vld [vmem:[%s5923_s20 + $0x60] sm:$0xff]  }
 0x49a   : > { %v3863_v43 = vadd.f32 %v3831_v32, %v3747_v1  ;;  %v3750_v13 = vadd.f32 %v4965_v36, %v6350_v53  ;;  %v3741_v14 = vpop.f32.mrb[79].mxu0 }
 0x49b   : > { %v3861_v15 = vadd.f32 %v3829_v26, %v3739_v30  ;;  %v3742_v18 = vadd.f32 %v6350_v53, %v3741_v14  ;;  %v3842_v14 = vunpack.c.h.bf16 %v5470_v10 }
 0x49c   : > { %v3895_v31 = vmax.f32 %v3863_v43, 0.0  ;;  %v3864_v17 = vadd.f32 %v3832_v58, %v3750_v13  ;;  %v3841_v58 = vunpack.c.l.bf16 %v5470_v10 }
 0x49d   : > { %v3893_v38 = vmax.f32 %v3861_v15, 0.0  ;;  %v3862_v59 = vadd.f32 %v3830_v12, %v3742_v18  ;;  %v3844_v12 = vunpack.c.h.bf16 %v5469_v63 }
 0x49e   : > { %3927 = vst [vmem:[%s6359_s12 + $0x70] sm:$0xff] %v3895_v31  ;;  %v3896_v39 = vmax.f32 %v3864_v17, 0.0 }
 0x49f   : > { %3925 = vst [vmem:[%s6359_s12 + $0x60] sm:$0xff] %v3893_v38  ;;  %v3894_v20 = vmax.f32 %v3862_v59, 0.0  ;;  %v4968_v21 = vpop.f32.mrb[80].mxu0 }
 0x4a0   : > { %3928 = vst [vmem:[%s6359_s12 + $0x78] sm:$0xff] %v3896_v39  ;;  %v3763_v23 = vadd.f32 %v4968_v21, %v6350_v53  ;;  %v3754_v41 = vpop.f32.mrb[81].mxu0  ;;  %v5471_v21 = vld [vmem:[%s5923_s20 + $0x78] sm:$0xff]  }
 0x4a1   : > { %3926 = vst [vmem:[%s6359_s12 + $0x68] sm:$0xff] %v3894_v20  ;;  %v3755_v6 = vadd.f32 %v6350_v53, %v3754_v41  ;;  %v4969_v29 = vpop.f32.mrb[82].mxu0  ;;  %v3847_v47 = vunpack.c.l.bf16 %v5471_v21  ;;  %v5472_v41 = vld [vmem:[%s5923_s20 + $0x70] sm:$0xff]   ;;  %s5587_s20 = scalar_lea.vmem %s6439_s16, 4096 }
 0x4a2   : > { %v3867_v11 = vadd.f32 %v3835_v2, %v3763_v23  ;;  %v3766_v44 = vadd.f32 %v4969_v29, %v6350_v53  ;;  %v3757_v9 = vpop.f32.mrb[83].mxu0  ;;  %p5588_p10 = scmp.ne.s32.totalorder %s6439_s16, %s5587_s20  ;;  %p5595_p1 = scmp.lt.s32.totalorder %s5593_s13, %s5587_s20 }
 0x4a3   : > { %v3865_v42 = vadd.f32 %v3833_v62, %v3755_v6  ;;  %v3758_v40 = vadd.f32 %v6350_v53, %v3757_v9  ;;  %v3846_v9 = vunpack.c.h.bf16 %v5472_v41 }
 0x4a4   : > { %v3899_v27 = vmax.f32 %v3867_v11, 0.0  ;;  %v3868_v49 = vadd.f32 %v3836_v48, %v3766_v44  ;;  %v3845_v48 = vunpack.c.l.bf16 %v5472_v41  ;;  %p5589_p3 = pnand %p5588_p10, %p5868_p5  ;;  %p5596_p2 = por %p5595_p1, %p5594_p12 }
 0x4a5   : > { %v3897_v50 = vmax.f32 %v3865_v42, 0.0  ;;  %v3866_v55 = vadd.f32 %v3834_v57, %v3758_v40  ;;  %v3848_v57 = vunpack.c.h.bf16 %v5471_v21 }
 0x4a6   : > { %3931 = vst [vmem:[%s6359_s12 + $0x90] sm:$0xff] %v3899_v27  ;;  %v3900_v54 = vmax.f32 %v3868_v49, 0.0  ;;  %p5590_p7 = pneg %p5589_p3 }
 0x4a7   : > { %3929 = vst [vmem:[%s6359_s12 + $0x80] sm:$0xff] %v3897_v50  ;;  %v3898_v37 = vmax.f32 %v3866_v55, 0.0  ;;  %v4972_v22 = vpop.f32.mrb[84].mxu0 }
 0x4a8   : > { %3932 = vst [vmem:[%s6359_s12 + $0x98] sm:$0xff] %v3900_v54  ;;  %v3779_v5 = vadd.f32 %v4972_v22, %v6350_v53  ;;  %v3770_v61 = vpop.f32.mrb[85].mxu0  ;;  %p5597_p4 = pnand %p5596_p2, %p5590_p7 }
 0x4a9   : > { %3930 = vst [vmem:[%s6359_s12 + $0x88] sm:$0xff] %v3898_v37  ;;  %v3771_v7 = vadd.f32 %v6350_v53, %v3770_v61  ;;  %v4973_v60 = vpop.f32.mrb[86].mxu0 }
 0x4aa   : > { %v3871_v4 = vadd.f32 %v3839_v8, %v3779_v5  ;;  %v3782_v16 = vadd.f32 %v4973_v60, %v6350_v53  ;;  %v3773_v33 = vpop.f32.mrb[87].mxu0 }
 0x4ab   : > { %v3869_v19 = vadd.f32 %v3837_v46, %v3771_v7  ;;  %v3774_v51 = vadd.f32 %v6350_v53, %v3773_v33 }
 0x4ac   : > { %v3903_v3 = vmax.f32 %v3871_v4, 0.0  ;;  %v3872_v24 = vadd.f32 %v3840_v28, %v3782_v16 }
 0x4ad   : > { %v3901_v52 = vmax.f32 %v3869_v19, 0.0  ;;  %v3870_v32 = vadd.f32 %v3838_v34, %v3774_v51 }
 0x4ae   : > { %3935 = vst [vmem:[%s6359_s12 + $0xb0] sm:$0xff] %v3903_v3  ;;  %v3904_v45 = vmax.f32 %v3872_v24, 0.0 }
 0x4af   : > { %3933 = vst [vmem:[%s6359_s12 + $0xa0] sm:$0xff] %v3901_v52  ;;  %v3902_v26 = vmax.f32 %v3870_v32, 0.0  ;;  %v4976_v1 = vpop.f32.mrb[88].mxu0 }
 0x4b0   : > { %3936 = vst [vmem:[%s6359_s12 + $0xb8] sm:$0xff] %v3904_v45  ;;  %v3795_v30 = vadd.f32 %v4976_v1, %v6350_v53  ;;  %v3786_v36 = vpop.f32.mrb[89].mxu0 }
 0x4b1   : > { %3934 = vst [vmem:[%s6359_s12 + $0xa8] sm:$0xff] %v3902_v26  ;;  %v3787_v43 = vadd.f32 %v6350_v53, %v3786_v36  ;;  %v4977_v13 = vpop.f32.mrb[90].mxu0 }
 0x4b2   : > { %v3875_v15 = vadd.f32 %v3843_v35, %v3795_v30  ;;  %v3798_v18 = vadd.f32 %v4977_v13, %v6350_v53  ;;  %v3789_v31 = vpop.f32.mrb[91].mxu0 }
 0x4b3   : > { %v3873_v17 = vadd.f32 %v3841_v58, %v3787_v43  ;;  %v3790_v38 = vadd.f32 %v6350_v53, %v3789_v31 }
 0x4b4   : > { %v3907_v59 = vmax.f32 %v3875_v15, 0.0  ;;  %v3876_v39 = vadd.f32 %v3844_v12, %v3798_v18 }
 0x4b5   : > { %v3905_v0 = vmax.f32 %v3873_v17, 0.0  ;;  %v3874_v2 = vadd.f32 %v3842_v14, %v3790_v38 }
 0x4b6   : > { %3939 = vst [vmem:[%s6359_s12 + $0xd0] sm:$0xff] %v3907_v59  ;;  %v3908_v20 = vmax.f32 %v3876_v39, 0.0 }
 0x4b7   : > { %3937 = vst [vmem:[%s6359_s12 + $0xc0] sm:$0xff] %v3905_v0  ;;  %v3906_v62 = vmax.f32 %v3874_v2, 0.0  ;;  %v4980_v23 = vpop.f32.mrb[92].mxu0 }
 0x4b8   : > { %3940 = vst [vmem:[%s6359_s12 + $0xd8] sm:$0xff] %v3908_v20  ;;  %v3811_v6 = vadd.f32 %v4980_v23, %v6350_v53  ;;  %v3802_v29 = vpop.f32.mrb[93].mxu0 }
 0x4b9   : > { %3938 = vst [vmem:[%s6359_s12 + $0xc8] sm:$0xff] %v3906_v62  ;;  %v3803_v11 = vadd.f32 %v6350_v53, %v3802_v29  ;;  %v4981_v44 = vpop.f32.mrb[94].mxu0 }
 0x4ba   : > { %v3879_v42 = vadd.f32 %v3847_v47, %v3811_v6  ;;  %v3814_v40 = vadd.f32 %v4981_v44, %v6350_v53  ;;  %v3805_v27 = vpop.f32.mrb[95].mxu0 }
 0x4bb   : > { %v3877_v49 = vadd.f32 %v3845_v48, %v3803_v11  ;;  %v3806_v50 = vadd.f32 %v6350_v53, %v3805_v27 }
 0x4bc   : > { %v3911_v55 = vmax.f32 %v3879_v42, 0.0  ;;  %v3880_v54 = vadd.f32 %v3848_v57, %v3814_v40 }
 0x4bd   : > { %v3909_v56 = vmax.f32 %v3877_v49, 0.0  ;;  %v3878_v8 = vadd.f32 %v3846_v9, %v3806_v50 }
 0x4be   : > { %3943 = vst [vmem:[%s6359_s12 + $0xf0] sm:$0xff] %v3911_v55  ;;  %v3912_v37 = vmax.f32 %v3880_v54, 0.0 }
 0x4bf   : > { %3941 = vst [vmem:[%s6359_s12 + $0xe0] sm:$0xff] %v3909_v56  ;;  %v3910_v53 = vmax.f32 %v3878_v8, 0.0 }
 0x4c0   : > { %3944 = vst [vmem:[%s6359_s12 + $0xf8] sm:$0xff] %v3912_v37 }
 0x4c1   : > { %3942 = vst [vmem:[%s6359_s12 + $0xe8] sm:$0xff] %v3910_v53 }
 0x4c2   : > { %5600 = shalt.err (!%p5597_p4)
}
 0x4c3   : > { %s5601_s15 = scalar_lea.hbm %s6437_s11, 4096  ;;  %s5605_s8 = scalar_lea.hbm %s6493_s7, 8192 }
 0x4c4   : > { %p5602_p9 = scmp.ne.s32.totalorder %s6437_s11, %s5601_s15  ;;  %p5606_p8 = scmp.lt.u32.totalorder %s6437_s11, %s6493_s7 }
 0x4c5   : > { %p5607_p13 = scmp.lt.u32.totalorder %s5605_s8, %s5601_s15  ;;  %p5609_p10 = scmp.lt.u32.totalorder %s5601_s15, %s6437_s11 }
 0x4c6   : > { %p5603_p0 = pnand %p5602_p9, %p5868_p5 }
 0x4c7   : > { %p5608_p6 = por %p5607_p13, %p5606_p8 }
 0x4c8   : > { %p5604_p11 = pneg %p5603_p0 }
 0x4c9   : > { %p5610_p3 = por %p5609_p10, %p5608_p6 }
 0x4cb   : > { %p5611_p7 = pnand %p5610_p3, %p5604_p11 }
 0x4cd   : > { %5614 = shalt.err (!%p5611_p7)
}
 0x4ce   : > { %s5672_s29 = smov 128   ;;  %s5673_s23 = smov 8  }
 0x4cf   : > { %5268 = dma.vmem_to_hbm [thread:$0]  (%p5868_p5), %s6439_s16, 4096, %s6437_s11, %s3946_s28, %s5672_s29, %s5672_s29, %s5673_s23  }
 0x4d0 PF: > { %s6513_s20 = sld [smem:[#allocation16_spill]]  ;;  %s3974_s30 = sand.u32 1, %s5649_s24  }
 0x4d1   : > { %p6515_p1 = scmp.ge.s32.totalorder %s5661_s27, 2  ;;  %s3975_s9 = scalar_lea.sflag [#allocation5], %s3974_s30 }
 0x4d6   : > { %p6514_p12 = scmp.ne.s32.totalorder %s6513_s20, 0 }
 0x4d8   : > { %p5285_p2 = pnand %p6515_p1, %p6514_p12 }
 0x4da   : > { %5644 = dma.done.wait (!%p5285_p2), %s3975_s9, 4096  }
 0x4db   : > { %5646 = vsyncadd (!%p5285_p2), %s3975_s9, 4294963200  ;;  %p22_p4 = scmp.ge.s32.totalorder %s5854_s22, 4   ;;  %s6516_s24 = smov %s5653_s25 }
 0x4dc   : > { %s6517_s25 = smov %s5657_s26  ;;  %s6518_s26 = smov %s5864_s18 }
 0x4dd   : > { %s6519_s27 = smov %s5854_s22  ;;  %24 = sbr.rel (!%p22_p4) target bundleno = 7 (0x7), region = 116 }
 0x4e4   :  { %3980 = vsyncpa [#allocation4], 1 }
 0x4e5   :  { %3982 = vsyncpa [#allocation4 + $0x1], 1 }
 0x4e6   :  { %3983 = vsyncpa [#allocation7], 1 }
 0x4e7   :  { %3984 = vsyncpa [#allocation10], 1 }
 0x4e8   :  { %3985 = vsyncpa [#allocation5], 1 }
 0x4e9   :  { %3987 = vsyncpa [#allocation5 + $0x1], 1 }

</bundles_post_ra>
